<compile_context>
chip_gen: v7x
topology: tpu7x:2x2x1
jax: 0.10.0
libtpu: 0.0.40
codegen_flags: <defaults>
</compile_context>

<pallas_src>
import functools

import jax
import jax.numpy as jnp
from jax.experimental import pallas as pl
from jax.experimental.pallas import tpu as pltpu


_TM_MAX = 512                       # adj row-tile (>=512 rows ~ HBM roofline)
_VMEM_LIMIT = 48 * 1024 * 1024      # sized for v7x's 64 MiB VMEM (fine on v5e/v6e)


# ---------------------------------------------------------------------------
# Fused per-layer kernel
#   grid = (num_row_tiles,)  over rows of adj / rows of the output
#   step 0 precomputes (into VMEM scratch, shared by all later steps):
#     xw   = x @ conv_w                                   [N, hidden]
#     gred = x_global @ W_global + red_b                  [N, c_out]
#   every step computes its row tile:
#     x_local = relu(adj_tile @ xw + conv_b)
#     y       = gred_tile + x_local @ W_local
#     out     = (final) ? y : bn_s * relu(y) + bn_t
# ---------------------------------------------------------------------------

def _fused_layer_kernel(adj_ref, x_ref, conv_w_ref, conv_b_ref,
                        att_w_ref, att_b_ref, wgu_ref, wgt_ref,
                        wl_ref, red_b_ref, bn_s_ref, bn_t_ref,
                        out_ref, xw_ref, gred_ref,
                        *, kp, final, mdt):
    n = x_ref.shape[0]
    tm = adj_ref.shape[0]

    # ---- step 0: global (whole-graph) precompute, kept in VMEM scratch ----
    @pl.when(pl.program_id(0) == 0)
    def _():
        x_m = x_ref[...].astype(mdt)

        # GCN: x @ conv_w (reused by every row tile of adj)
        xw_ref[...] = jnp.dot(x_m, conv_w_ref[...].astype(mdt),
                              preferred_element_type=jnp.float32).astype(xw_ref.dtype)

        # Low-rank global attention (LRGA).  k is zero-padded to kp=128, so the
        # padded U/V/Z/T lanes are exactly zero and contribute nothing.
        tmp = jnp.dot(x_m, att_w_ref[...].astype(mdt),
                      preferred_element_type=jnp.float32) + att_b_ref[...]
        tmp = jnp.maximum(tmp, 0.0)                       # [N, 4*kp]
        u = tmp[:, 0 * kp:1 * kp]
        v = tmp[:, 1 * kp:2 * kp]
        z = tmp[:, 2 * kp:3 * kp]
        t = tmp[:, 3 * kp:4 * kp]

        # V^T @ Z as a contraction over the node axis (no explicit transpose).
        vz = jax.lax.dot_general(v.astype(mdt), z.astype(mdt),
                                 (((0,), (0,)), ((), ())),
                                 preferred_element_type=jnp.float32)   # [kp, kp]
        res = jnp.dot(u.astype(mdt), vz.astype(mdt),
                      preferred_element_type=jnp.float32)              # [N, kp]

        # joint_normalize2: sum(U @ (V^T @ 1)) / N + 1e-6
        norm = jnp.sum(jnp.sum(u, axis=0) * jnp.sum(v, axis=0)) / n + 1e-6
        d = 1.0 / norm

        # x_global @ W_global + b, with W_global split into the U-part / T-part
        # (== concat([res/norm, t], 1) @ red_wg + red_b, but lane-aligned).
        gred = (d * jnp.dot(res.astype(mdt), wgu_ref[...].astype(mdt),
                            preferred_element_type=jnp.float32)
                + jnp.dot(t.astype(mdt), wgt_ref[...].astype(mdt),
                          preferred_element_type=jnp.float32)
                + red_b_ref[...])
        if n == gred_ref.shape[0]:
            gred_ref[...] = gred
        else:
            gred_ref[:n, :] = gred

    # ---- per row-tile work ----
    i = pl.program_id(0)
    row0 = pl.multiple_of(i * tm, tm)

    x_local = jnp.dot(adj_ref[...].astype(mdt), xw_ref[...],
                      preferred_element_type=jnp.float32) + conv_b_ref[...]
    x_local = jnp.maximum(x_local, 0.0)
    # TODO(synk): F.dropout(x_local) is stochastic in training mode; inference
    # mode (identity) is implemented for determinism.

    y = (gred_ref[pl.ds(row0, tm), :]
         + jnp.dot(x_local.astype(mdt), wl_ref[...].astype(mdt),
                   preferred_element_type=jnp.float32))

    if final:
        out_ref[...] = y
    else:
        y = jnp.maximum(y, 0.0)
        # eval-mode BatchNorm1d folded into a per-channel affine
        out_ref[...] = y * bn_s_ref[...] + bn_t_ref[...]


# ---------------------------------------------------------------------------
# Wrapper: parameter padding + pallas_call
# ---------------------------------------------------------------------------

def _replicated_spec(shape):
    return pl.BlockSpec(shape, lambda i, _nd=len(shape): (0,) * _nd)


def _pad_lra_params(att_w, att_b, red_wg, k, kp):
    """Zero-pad k -> kp so U/V/Z/T land at 128-lane offsets; split red_wg."""
    c_in = att_w.shape[0]
    c_out = red_wg.shape[1]
    if k == kp:
        att_w_p, att_b_p = att_w, att_b
        wgu, wgt = red_wg[:k], red_wg[k:]
    else:
        att_w_p = jnp.zeros((c_in, 4 * kp), att_w.dtype)
        att_b_p = jnp.zeros((4 * kp,), att_b.dtype)
        for j in range(4):
            att_w_p = att_w_p.at[:, j * kp:j * kp + k].set(att_w[:, j * k:(j + 1) * k])
            att_b_p = att_b_p.at[j * kp:j * kp + k].set(att_b[j * k:(j + 1) * k])
        # Padded weight rows are zeroed (the padded activations are exactly 0
        # anyway because relu(x @ 0 + 0) == 0).
        wgu = jnp.zeros((kp, c_out), red_wg.dtype).at[:k].set(red_wg[:k])
        wgt = jnp.zeros((kp, c_out), red_wg.dtype).at[:k].set(red_wg[k:])
    return att_w_p, att_b_p.reshape(1, 4 * kp), wgu, wgt


def fused_layer(adj, x, p, *, k, final, matmul_dtype=jnp.float32):
    n, c_in = x.shape
    hidden = p["conv_w"].shape[1]
    c_out = p["red_wl"].shape[1]
    kp = ((k + 127) // 128) * 128                      # lane-aligned rank
    tm = min(_TM_MAX, n)                               # adj row tile
    nt = pl.cdiv(n, tm)

    att_w_p, att_b_p, wgu, wgt = _pad_lra_params(p["att_w"], p["att_b"],
                                                 p["red_wg"], k, kp)
    conv_b = p["conv_b"].reshape(1, hidden)
    red_b = p["red_b"].reshape(1, c_out)
    if final:
        bn_s = jnp.zeros((1, c_out), jnp.float32)      # unused dummies
        bn_t = jnp.zeros((1, c_out), jnp.float32)
    else:
        s = p["bn_gamma"] * jax.lax.rsqrt(p["bn_var"] + 1e-5)
        bn_s = s.reshape(1, c_out)
        bn_t = (p["bn_beta"] - p["bn_mean"] * s).reshape(1, c_out)

    kern = functools.partial(_fused_layer_kernel, kp=kp, final=final,
                             mdt=matmul_dtype)

    # TODO(synk): the row axis stays "arbitrary" because grid step 0 fills the
    # shared VMEM scratch (xw / gred).  To shard across v7x's 2 TensorCores,
    # move that precompute into a separate tiny kernel (or replicate per core)
    # and mark the axis "parallel".
    return pl.pallas_call(
        kern,
        grid=(nt,),
        in_specs=[
            pl.BlockSpec((tm, n), lambda i: (i, 0)),       # adj row tile
            _replicated_spec((n, c_in)),                   # x (whole graph)
            _replicated_spec((c_in, hidden)),              # conv_w
            _replicated_spec((1, hidden)),                 # conv_b
            _replicated_spec((c_in, 4 * kp)),              # att_w (padded)
            _replicated_spec((1, 4 * kp)),                 # att_b (padded)
            _replicated_spec((kp, c_out)),                 # red_wg (U part)
            _replicated_spec((kp, c_out)),                 # red_wg (T part)
            _replicated_spec((hidden, c_out)),             # red_wl
            _replicated_spec((1, c_out)),                  # red_b
            _replicated_spec((1, c_out)),                  # bn scale
            _replicated_spec((1, c_out)),                  # bn shift
        ],
        out_specs=pl.BlockSpec((tm, c_out), lambda i: (i, 0)),
        out_shape=jax.ShapeDtypeStruct((n, c_out), jnp.float32),
        scratch_shapes=[
            pltpu.VMEM((n, hidden), matmul_dtype),         # xw = x @ conv_w
            pltpu.VMEM((nt * tm, c_out), jnp.float32),     # global-branch output
        ],
        compiler_params=pltpu.CompilerParams(
            dimension_semantics=("arbitrary",),
            vmem_limit_bytes=_VMEM_LIMIT),
    )(adj, x, p["conv_w"], conv_b, att_w_p, att_b_p,
      wgu, wgt, p["red_wl"], red_b, bn_s, bn_t)


# ---------------------------------------------------------------------------
# Full GCNWithAttention forward
# ---------------------------------------------------------------------------

def gcn_with_attention_forward(x, adj, params, *, k, matmul_dtype=jnp.float32):
    layers = params["layers"]
    for p in layers[:-1]:
        x = fused_layer(adj, x, p, k=k, final=False, matmul_dtype=matmul_dtype)
    return fused_layer(adj, x, layers[-1], k=k, final=True,
                       matmul_dtype=matmul_dtype)


# ---------------------------------------------------------------------------
# Deterministic parameter init (synthetic; shapes follow the PyTorch __init__)
# ---------------------------------------------------------------------------

def init_params(key, *, in_channels, hidden, out_channels, num_layers, k):
    layers = []
    for i in range(num_layers):
        c_in = in_channels if i == 0 else hidden
        c_out = out_channels if i == num_layers - 1 else hidden
        key, *ks = jax.random.split(key, 8)
        p = {
            "conv_w": 0.1 * jax.random.normal(ks[0], (c_in, hidden), jnp.float32),
            "conv_b": 0.1 * jax.random.normal(ks[1], (hidden,), jnp.float32),
            "att_w": 0.1 * jax.random.normal(ks[2], (c_in, 4 * k), jnp.float32),
            "att_b": 0.1 * jax.random.normal(ks[3], (4 * k,), jnp.float32),
            "red_wg": 0.1 * jax.random.normal(ks[4], (2 * k, c_out), jnp.float32),
            "red_wl": 0.1 * jax.random.normal(ks[5], (hidden, c_out), jnp.float32),
            "red_b": 0.1 * jax.random.normal(ks[6], (c_out,), jnp.float32),
        }
        if i < num_layers - 1:
            key, k1, k2, k3, k4 = jax.random.split(key, 5)
            p["bn_gamma"] = 1.0 + 0.1 * jax.random.normal(k1, (hidden,), jnp.float32)
            p["bn_beta"] = 0.1 * jax.random.normal(k2, (hidden,), jnp.float32)
            p["bn_mean"] = 0.1 * jax.random.normal(k3, (hidden,), jnp.float32)
            p["bn_var"] = 1.0 + 0.1 * jax.random.uniform(k4, (hidden,), jnp.float32)
        layers.append(p)
    return {"layers": layers}


# ---------------------------------------------------------------------------
# Pure-JAX reference (correctness check, uses the original unpadded params)
# ---------------------------------------------------------------------------

def reference_forward(x, adj, params, *, k):
    n = x.shape[0]

    def lra(h, w, b):
        tmp = jnp.maximum(h @ w + b, 0.0)
        u, v, z, t = tmp[:, :k], tmp[:, k:2 * k], tmp[:, 2 * k:3 * k], tmp[:, 3 * k:]
        norm = jnp.sum(u @ (v.T @ jnp.ones((n, 1), jnp.float32))) / n + 1e-6
        res = u @ (v.T @ z)
        return jnp.concatenate([res / norm, t], axis=1)

    layers = params["layers"]
    for p in layers[:-1]:
        x_local = jnp.maximum(adj @ (x @ p["conv_w"]) + p["conv_b"], 0.0)
        x_global = lra(x, p["att_w"], p["att_b"])
        w_full = jnp.concatenate([p["red_wg"], p["red_wl"]], axis=0)
        y = jnp.concatenate([x_global, x_local], axis=1) @ w_full + p["red_b"]
        y = jnp.maximum(y, 0.0)
        x = ((y - p["bn_mean"]) / jnp.sqrt(p["bn_var"] + 1e-5) * p["bn_gamma"]
             + p["bn_beta"])
    p = layers[-1]
    x_local = jnp.maximum(adj @ (x @ p["conv_w"]) + p["conv_b"], 0.0)
    x_global = lra(x, p["att_w"], p["att_b"])
    w_full = jnp.concatenate([p["red_wg"], p["red_wl"]], axis=0)
    return jnp.concatenate([x_global, x_local], axis=1) @ w_full + p["red_b"]


# ---------------------------------------------------------------------------

if __name__ == "__main__":
    jax.config.update("jax_default_matmul_precision", "highest")

    N, IN_C, HID, OUT_C = 16, 8, 32, 16
    NUM_LAYERS, K = 2, 100  # k=100 hardcoded in the PyTorch module

    key = jax.random.PRNGKey(0)
    key, k_x, k_adj, k_p = jax.random.split(key, 4)

    x = jax.random.normal(k_x, (N, IN_C), dtype=jnp.float32)

    # Dense symmetric adjacency with self-loops, symmetrically normalized.
    a = (jax.random.uniform(k_adj, (N, N)) < 0.3).astype(jnp.float32)
    a = jnp.minimum(jnp.maximum(a, a.T) + jnp.eye(N, dtype=jnp.float32), 1.0)
    deg_inv_sqrt = 1.0 / jnp.sqrt(jnp.sum(a, axis=1))
    adj = a * deg_inv_sqrt[:, None] * deg_inv_sqrt[None, :]

    params = init_params(k_p, in_channels=IN_C, hidden=HID,
                         out_channels=OUT_C, num_layers=NUM_LAYERS, k=K)

    # f32 path
    out = jax.block_until_ready(gcn_with_attention_forward(x, adj, params, k=K))
    assert out.shape == (N, OUT_C), out.shape

    ref = jax.block_until_ready(reference_forward(x, adj, params, k=K))
    assert jnp.allclose(out, ref, atol=2e-2, rtol=2e-2), \
        float(jnp.max(jnp.abs(out - ref)))

    # bf16 matmul operands + f32 accumulation (v6e/v7x MXU/bandwidth lever).
    out_bf16 = jax.block_until_ready(
        gcn_with_attention_forward(x, adj, params, k=K,
                                   matmul_dtype=jnp.bfloat16))
    assert jnp.allclose(out_bf16, ref, atol=5e-2, rtol=5e-2), \
        float(jnp.max(jnp.abs(out_bf16 - ref)))

    print("KERNEL_OK")
</pallas_src>

<mosaic_0001>
module attributes {stable_mosaic.version = 11 : i64} {
  func.func @_fused_layer_kernel(%arg0: i32, %arg1: memref<16x16xf32, #tpu.memory_space<vmem>>, %arg2: memref<16x8xf32, #tpu.memory_space<vmem>>, %arg3: memref<8x32xf32, #tpu.memory_space<vmem>>, %arg4: memref<1x32xf32, #tpu.memory_space<vmem>>, %arg5: memref<8x512xf32, #tpu.memory_space<vmem>>, %arg6: memref<1x512xf32, #tpu.memory_space<vmem>>, %arg7: memref<128x32xf32, #tpu.memory_space<vmem>>, %arg8: memref<128x32xf32, #tpu.memory_space<vmem>>, %arg9: memref<32x32xf32, #tpu.memory_space<vmem>>, %arg10: memref<1x32xf32, #tpu.memory_space<vmem>>, %arg11: memref<1x32xf32, #tpu.memory_space<vmem>>, %arg12: memref<1x32xf32, #tpu.memory_space<vmem>>, %arg13: memref<16x32xf32, #tpu.memory_space<vmem>>, %arg14: memref<16x32xf32, #tpu.memory_space<vmem>>, %arg15: memref<16x32xf32, #tpu.memory_space<vmem>>) attributes {dimension_semantics = [#tpu.dimension_semantics<arbitrary>], iteration_bounds = array<i64: 1>, scalar_prefetch = 0 : i64, scratch_operands = 2 : i64, tpu.core_type = #tpu.core_type<tc>, window_params = [{transform_indices = @transform_0, window_bounds = array<i64: 16, 16>}, {pipeline_mode = #tpu.pipeline_mode<synchronous>, transform_indices = @transform_1, window_bounds = array<i64: 16, 8>}, {pipeline_mode = #tpu.pipeline_mode<synchronous>, transform_indices = @transform_2, window_bounds = array<i64: 8, 32>}, {pipeline_mode = #tpu.pipeline_mode<synchronous>, transform_indices = @transform_3, window_bounds = array<i64: 1, 32>}, {pipeline_mode = #tpu.pipeline_mode<synchronous>, transform_indices = @transform_4, window_bounds = array<i64: 8, 512>}, {pipeline_mode = #tpu.pipeline_mode<synchronous>, transform_indices = @transform_5, window_bounds = array<i64: 1, 512>}, {pipeline_mode = #tpu.pipeline_mode<synchronous>, transform_indices = @transform_6, window_bounds = array<i64: 128, 32>}, {pipeline_mode = #tpu.pipeline_mode<synchronous>, transform_indices = @transform_7, window_bounds = array<i64: 128, 32>}, {pipeline_mode = #tpu.pipeline_mode<synchronous>, transform_indices = @transform_8, window_bounds = array<i64: 32, 32>}, {pipeline_mode = #tpu.pipeline_mode<synchronous>, transform_indices = @transform_9, window_bounds = array<i64: 1, 32>}, {pipeline_mode = #tpu.pipeline_mode<synchronous>, transform_indices = @transform_10, window_bounds = array<i64: 1, 32>}, {pipeline_mode = #tpu.pipeline_mode<synchronous>, transform_indices = @transform_11, window_bounds = array<i64: 1, 32>}, {transform_indices = @transform_12, window_bounds = array<i64: 16, 32>}]} {
    %c0_i32 = arith.constant 0 : i32
    %0 = arith.cmpi eq, %arg0, %c0_i32 : i32
    %1 = arith.extui %0 : i1 to i32
    %c0_i32_0 = arith.constant 0 : i32
    %2 = arith.cmpi ne, %1, %c0_i32_0 : i32
    scf.if %2 {
      %c0_18 = arith.constant 0 : index
      %c0_19 = arith.constant 0 : index
      %27 = vector.load %arg2[%c0_18, %c0_19] : memref<16x8xf32, #tpu.memory_space<vmem>>, vector<16x8xf32>
      %c0_20 = arith.constant 0 : index
      %c0_21 = arith.constant 0 : index
      %28 = vector.load %arg3[%c0_20, %c0_21] : memref<8x32xf32, #tpu.memory_space<vmem>>, vector<8x32xf32>
      %cst_22 = arith.constant dense<0.000000e+00> : vector<16x32xf32>
      %29 = tpu.matmul %27, %28, %cst_22 {dimension_numbers = #tpu.dot_dimension_numbers<[1], [0], [0], [1], [0, 0, 1, 1], [], []>, precision = #tpu.contract_precision<fp32>} : vector<16x8xf32>, vector<8x32xf32>, vector<16x32xf32> -> vector<16x32xf32>
      %c0_23 = arith.constant 0 : index
      %c0_24 = arith.constant 0 : index
      %30 = vector.load %arg14[%c0_23, %c0_24] : memref<16x32xf32, #tpu.memory_space<vmem>>, vector<16x32xf32>
      tpu.vector_store %arg14[%c0_23, %c0_24], %29 {strides = array<i32>} : memref<16x32xf32, #tpu.memory_space<vmem>>, vector<16x32xf32>,
      %c0_25 = arith.constant 0 : index
      %c0_26 = arith.constant 0 : index
      %31 = vector.load %arg5[%c0_25, %c0_26] : memref<8x512xf32, #tpu.memory_space<vmem>>, vector<8x512xf32>
      %cst_27 = arith.constant dense<0.000000e+00> : vector<16x512xf32>
      %32 = tpu.matmul %27, %31, %cst_27 {dimension_numbers = #tpu.dot_dimension_numbers<[1], [0], [0], [1], [0, 0, 1, 1], [], []>, precision = #tpu.contract_precision<fp32>} : vector<16x8xf32>, vector<8x512xf32>, vector<16x512xf32> -> vector<16x512xf32>
      %c0_28 = arith.constant 0 : index
      %c0_29 = arith.constant 0 : index
      %33 = vector.load %arg6[%c0_28, %c0_29] : memref<1x512xf32, #tpu.memory_space<vmem>>, vector<1x512xf32>
      %34 = vector.broadcast %33 : vector<1x512xf32> to vector<16x512xf32>
      %35 = arith.addf %32, %34 : vector<16x512xf32>
      %cst_30 = arith.constant 0.000000e+00 : f32
      %36 = vector.broadcast %cst_30 : f32 to vector<16x512xf32>
      %37 = arith.maximumf %35, %36 : vector<16x512xf32>
      %38 = vector.extract_strided_slice %37 {offsets = [0, 0], sizes = [16, 128], strides = [1, 1]} : vector<16x512xf32> to vector<16x128xf32>
      %39 = vector.extract_strided_slice %37 {offsets = [0, 128], sizes = [16, 128], strides = [1, 1]} : vector<16x512xf32> to vector<16x128xf32>
      %40 = vector.extract_strided_slice %37 {offsets = [0, 256], sizes = [16, 128], strides = [1, 1]} : vector<16x512xf32> to vector<16x128xf32>
      %41 = vector.extract_strided_slice %37 {offsets = [0, 384], sizes = [16, 128], strides = [1, 1]} : vector<16x512xf32> to vector<16x128xf32>
      %cst_31 = arith.constant dense<0.000000e+00> : vector<128x128xf32>
      %42 = tpu.matmul %39, %40, %cst_31 {dimension_numbers = #tpu.dot_dimension_numbers<[0], [0], [1], [1], [0, 1, 1, 1], [], []>, precision = #tpu.contract_precision<fp32>} : vector<16x128xf32>, vector<16x128xf32>, vector<128x128xf32> -> vector<128x128xf32>
      %cst_32 = arith.constant dense<0.000000e+00> : vector<16x128xf32>
      %43 = tpu.matmul %38, %42, %cst_32 {dimension_numbers = #tpu.dot_dimension_numbers<[1], [0], [0], [1], [0, 0, 1, 1], [], []>, precision = #tpu.contract_precision<fp32>} : vector<16x128xf32>, vector<128x128xf32>, vector<16x128xf32> -> vector<16x128xf32>
      %cst_33 = arith.constant dense<0.000000e+00> : vector<128xf32>
      %44 = vector.multi_reduction <add>, %38, %cst_33 [0] : vector<16x128xf32> to vector<128xf32>
      %cst_34 = arith.constant dense<0.000000e+00> : vector<128xf32>
      %45 = vector.multi_reduction <add>, %39, %cst_34 [0] : vector<16x128xf32> to vector<128xf32>
      %46 = arith.mulf %44, %45 : vector<128xf32>
      %47 = vector.shape_cast %46 : vector<128xf32> to vector<1x128xf32>
      %cst_35 = arith.constant dense<0.000000e+00> : vector<1xf32>
      %48 = vector.multi_reduction <add>, %47, %cst_35 [1] : vector<1x128xf32> to vector<1xf32>
      %49 = vector.shape_cast %48 : vector<1xf32> to vector<1x1xf32>
      %50 = vector.extract %49[0, 0] : f32 from vector<1x1xf32>
      %cst_36 = arith.constant 1.600000e+01 : f32
      %51 = arith.divf %50, %cst_36 : f32
      %cst_37 = arith.constant 9.99999997E-7 : f32
      %52 = arith.addf %51, %cst_37 : f32
      %cst_38 = arith.constant 1.000000e+00 : f32
      %53 = arith.divf %cst_38, %52 : f32
      %c0_39 = arith.constant 0 : index
      %c0_40 = arith.constant 0 : index
      %54 = vector.load %arg7[%c0_39, %c0_40] : memref<128x32xf32, #tpu.memory_space<vmem>>, vector<128x32xf32>
      %cst_41 = arith.constant dense<0.000000e+00> : vector<16x32xf32>
      %55 = tpu.matmul %43, %54, %cst_41 {dimension_numbers = #tpu.dot_dimension_numbers<[1], [0], [0], [1], [0, 0, 1, 1], [], []>, precision = #tpu.contract_precision<fp32>} : vector<16x128xf32>, vector<128x32xf32>, vector<16x32xf32> -> vector<16x32xf32>
      %56 = vector.broadcast %53 : f32 to vector<16x32xf32>
      %57 = arith.mulf %56, %55 : vector<16x32xf32>
      %c0_42 = arith.constant 0 : index
      %c0_43 = arith.constant 0 : index
      %58 = vector.load %arg8[%c0_42, %c0_43] : memref<128x32xf32, #tpu.memory_space<vmem>>, vector<128x32xf32>
      %cst_44 = arith.constant dense<0.000000e+00> : vector<16x32xf32>
      %59 = tpu.matmul %41, %58, %cst_44 {dimension_numbers = #tpu.dot_dimension_numbers<[1], [0], [0], [1], [0, 0, 1, 1], [], []>, precision = #tpu.contract_precision<fp32>} : vector<16x128xf32>, vector<128x32xf32>, vector<16x32xf32> -> vector<16x32xf32>
      %60 = arith.addf %57, %59 : vector<16x32xf32>
      %c0_45 = arith.constant 0 : index
      %c0_46 = arith.constant 0 : index
      %61 = vector.load %arg10[%c0_45, %c0_46] : memref<1x32xf32, #tpu.memory_space<vmem>>, vector<1x32xf32>
      %62 = vector.broadcast %61 : vector<1x32xf32> to vector<16x32xf32>
      %63 = arith.addf %60, %62 : vector<16x32xf32>
      %c0_47 = arith.constant 0 : index
      %c0_48 = arith.constant 0 : index
      %64 = vector.load %arg15[%c0_47, %c0_48] : memref<16x32xf32, #tpu.memory_space<vmem>>, vector<16x32xf32>
      tpu.vector_store %arg15[%c0_47, %c0_48], %63 {strides = array<i32>} : memref<16x32xf32, #tpu.memory_space<vmem>>, vector<16x32xf32>,
    } else {
    }
    %c16_i32 = arith.constant 16 : i32
    %3 = arith.muli %arg0, %c16_i32 : i32
    %4 = tpu.assume_multiple %3, 16 : i32
    %c0 = arith.constant 0 : index
    %c0_1 = arith.constant 0 : index
    %5 = vector.load %arg1[%c0, %c0_1] : memref<16x16xf32, #tpu.memory_space<vmem>>, vector<16x16xf32>
    %c0_2 = arith.constant 0 : index
    %c0_3 = arith.constant 0 : index
    %6 = vector.load %arg14[%c0_2, %c0_3] : memref<16x32xf32, #tpu.memory_space<vmem>>, vector<16x32xf32>
    %cst = arith.constant dense<0.000000e+00> : vector<16x32xf32>
    %7 = tpu.matmul %5, %6, %cst {dimension_numbers = #tpu.dot_dimension_numbers<[1], [0], [0], [1], [0, 0, 1, 1], [], []>, precision = #tpu.contract_precision<fp32>} : vector<16x16xf32>, vector<16x32xf32>, vector<16x32xf32> -> vector<16x32xf32>
    %c0_4 = arith.constant 0 : index
    %c0_5 = arith.constant 0 : index
    %8 = vector.load %arg4[%c0_4, %c0_5] : memref<1x32xf32, #tpu.memory_space<vmem>>, vector<1x32xf32>
    %9 = vector.broadcast %8 : vector<1x32xf32> to vector<16x32xf32>
    %10 = arith.addf %7, %9 : vector<16x32xf32>
    %cst_6 = arith.constant 0.000000e+00 : f32
    %11 = vector.broadcast %cst_6 : f32 to vector<16x32xf32>
    %12 = arith.maximumf %10, %11 : vector<16x32xf32>
    %13 = arith.index_cast %4 : i32 to index
    %c0_7 = arith.constant 0 : index
    %14 = vector.load %arg15[%13, %c0_7] : memref<16x32xf32, #tpu.memory_space<vmem>>, vector<16x32xf32>
    %c0_8 = arith.constant 0 : index
    %c0_9 = arith.constant 0 : index
    %15 = vector.load %arg9[%c0_8, %c0_9] : memref<32x32xf32, #tpu.memory_space<vmem>>, vector<32x32xf32>
    %cst_10 = arith.constant dense<0.000000e+00> : vector<16x32xf32>
    %16 = tpu.matmul %12, %15, %cst_10 {dimension_numbers = #tpu.dot_dimension_numbers<[1], [0], [0], [1], [0, 0, 1, 1], [], []>, precision = #tpu.contract_precision<fp32>} : vector<16x32xf32>, vector<32x32xf32>, vector<16x32xf32> -> vector<16x32xf32>
    %17 = arith.addf %14, %16 : vector<16x32xf32>
    %cst_11 = arith.constant 0.000000e+00 : f32
    %18 = vector.broadcast %cst_11 : f32 to vector<16x32xf32>
    %19 = arith.maximumf %17, %18 : vector<16x32xf32>
    %c0_12 = arith.constant 0 : index
    %c0_13 = arith.constant 0 : index
    %20 = vector.load %arg11[%c0_12, %c0_13] : memref<1x32xf32, #tpu.memory_space<vmem>>, vector<1x32xf32>
    %21 = vector.broadcast %20 : vector<1x32xf32> to vector<16x32xf32>
    %22 = arith.mulf %19, %21 : vector<16x32xf32>
    %c0_14 = arith.constant 0 : index
    %c0_15 = arith.constant 0 : index
    %23 = vector.load %arg12[%c0_14, %c0_15] : memref<1x32xf32, #tpu.memory_space<vmem>>, vector<1x32xf32>
    %24 = vector.broadcast %23 : vector<1x32xf32> to vector<16x32xf32>
    %25 = arith.addf %22, %24 : vector<16x32xf32>
    %c0_16 = arith.constant 0 : index
    %c0_17 = arith.constant 0 : index
    %26 = vector.load %arg13[%c0_16, %c0_17] : memref<16x32xf32, #tpu.memory_space<vmem>>, vector<16x32xf32>
    tpu.vector_store %arg13[%c0_16, %c0_17], %25 {strides = array<i32>} : memref<16x32xf32, #tpu.memory_space<vmem>>, vector<16x32xf32>,
    return
  }
  func.func @transform_0(%arg0: i32) -> (i32, i32) {
    %c0_i32 = arith.constant 0 : i32
    %c0_i32_0 = arith.constant 0 : i32
    return %arg0, %c0_i32 : i32, i32
  }
  func.func @transform_1(%arg0: i32) -> (i32, i32) {
    %c0_i32 = arith.constant 0 : i32
    %c0_i32_0 = arith.constant 0 : i32
    %c0_i32_1 = arith.constant 0 : i32
    return %c0_i32, %c0_i32_0 : i32, i32
  }
  func.func @transform_2(%arg0: i32) -> (i32, i32) {
    %c0_i32 = arith.constant 0 : i32
    %c0_i32_0 = arith.constant 0 : i32
    %c0_i32_1 = arith.constant 0 : i32
    return %c0_i32, %c0_i32_0 : i32, i32
  }
  func.func @transform_3(%arg0: i32) -> (i32, i32) {
    %c0_i32 = arith.constant 0 : i32
    %c0_i32_0 = arith.constant 0 : i32
    %c0_i32_1 = arith.constant 0 : i32
    return %c0_i32, %c0_i32_0 : i32, i32
  }
  func.func @transform_4(%arg0: i32) -> (i32, i32) {
    %c0_i32 = arith.constant 0 : i32
    %c0_i32_0 = arith.constant 0 : i32
    %c0_i32_1 = arith.constant 0 : i32
    return %c0_i32, %c0_i32_0 : i32, i32
  }
  func.func @transform_5(%arg0: i32) -> (i32, i32) {
    %c0_i32 = arith.constant 0 : i32
    %c0_i32_0 = arith.constant 0 : i32
    %c0_i32_1 = arith.constant 0 : i32
    return %c0_i32, %c0_i32_0 : i32, i32
  }
  func.func @transform_6(%arg0: i32) -> (i32, i32) {
    %c0_i32 = arith.constant 0 : i32
    %c0_i32_0 = arith.constant 0 : i32
    %c0_i32_1 = arith.constant 0 : i32
    return %c0_i32, %c0_i32_0 : i32, i32
  }
  func.func @transform_7(%arg0: i32) -> (i32, i32) {
    %c0_i32 = arith.constant 0 : i32
    %c0_i32_0 = arith.constant 0 : i32
    %c0_i32_1 = arith.constant 0 : i32
    return %c0_i32, %c0_i32_0 : i32, i32
  }
  func.func @transform_8(%arg0: i32) -> (i32, i32) {
    %c0_i32 = arith.constant 0 : i32
    %c0_i32_0 = arith.constant 0 : i32
    %c0_i32_1 = arith.constant 0 : i32
    return %c0_i32, %c0_i32_0 : i32, i32
  }
  func.func @transform_9(%arg0: i32) -> (i32, i32) {
    %c0_i32 = arith.constant 0 : i32
    %c0_i32_0 = arith.constant 0 : i32
    %c0_i32_1 = arith.constant 0 : i32
    return %c0_i32, %c0_i32_0 : i32, i32
  }
  func.func @transform_10(%arg0: i32) -> (i32, i32) {
    %c0_i32 = arith.constant 0 : i32
    %c0_i32_0 = arith.constant 0 : i32
    %c0_i32_1 = arith.constant 0 : i32
    return %c0_i32, %c0_i32_0 : i32, i32
  }
  func.func @transform_11(%arg0: i32) -> (i32, i32) {
    %c0_i32 = arith.constant 0 : i32
    %c0_i32_0 = arith.constant 0 : i32
    %c0_i32_1 = arith.constant 0 : i32
    return %c0_i32, %c0_i32_0 : i32, i32
  }
  func.func @transform_12(%arg0: i32) -> (i32, i32) {
    %c0_i32 = arith.constant 0 : i32
    %c0_i32_0 = arith.constant 0 : i32
    return %arg0, %c0_i32 : i32, i32
  }
}

</mosaic_0001>

<bundles_post_ra>
// kernel: tpu_custom_call.1
= control target key start
LH: loop header
LB: loop body
LE: loop exit
PB: predicated region body
PF: predicated region fallthrough
CT: control target
= control target key end

     0   :  { %vm49_vm0 = vcmask 64512   ;;  %v8371_v5 = vmov 0.0   ;;  %s9900_s0 = inlined_call_operand.vmem [shape: f32[16,16], index: 0, kind: input, shape index: {}]   ;;  %s9901_s1 = inlined_call_operand.vmem [shape: f32[16,8], index: 1, kind: input, shape index: {}]   ;;  %s9902_s2 = inlined_call_operand.vmem [shape: f32[8,32], index: 2, kind: input, shape index: {}]   ;;  %s9903_s3 = inlined_call_operand.vmem [shape: f32[1,32], index: 3, kind: input, shape index: {}]   ;;  %s9904_s4 = inlined_call_operand.vmem [shape: f32[8,512], index: 4, kind: input, shape index: {}]   ;;  %s9905_s5 = inlined_call_operand.vmem [shape: f32[1,512], index: 5, kind: input, shape index: {}]   ;;  %s9906_s6 = inlined_call_operand.vmem [shape: f32[128,32], index: 6, kind: input, shape index: {}]   ;;  %s9907_s7 = inlined_call_operand.vmem [shape: f32[128,32], index: 7, kind: input, shape index: {}]   ;;  %s9908_s8 = inlined_call_operand.vmem [shape: f32[32,32], index: 8, kind: input, shape index: {}]   ;;  %s9909_s9 = inlined_call_operand.vmem [shape: f32[1,32], index: 9, kind: input, shape index: {}]   ;;  %s9910_s10 = inlined_call_operand.vmem [shape: f32[1,32], index: 10, kind: input, shape index: {}]   ;;  %s9911_s11 = inlined_call_operand.vmem [shape: f32[1,32], index: 11, kind: input, shape index: {}]   ;;  %s9912_s12 = inlined_call_operand.hbm [shape: f32[16,32], index: 12, kind: output, shape index: {}]  }
   0x1   :  { %v549_v0 = vld [vmem:[%s9904_s4 + $0x8] sm:$0xff]  ;;  %v548_v1 = vld [vmem:[%s9904_s4] sm:$0xff]  ;;  %640 = vmatprep.mubr.f32.mxu1 %v8371_v5 }
   0x2   :  { %v46_v2 = vld [vmem:[%s9901_s1] sm:$0xff]  ;;  %v8449_v3 = vand.u32 4294901760, %v549_v0  ;;  %v8451_v4 = vand.u32 4294901760, %v548_v1  ;;  %v47_v7 = vld [vmem:[%s9901_s1 + $0x8] sm:$0xff] }
   0x3   :  { %v51_v6 = vsel %vm49_vm0, %v46_v2, 0  ;;  %v48_v8 = vld [vmem:[%s9902_s2] sm:$0xff]  ;;  %v54_v10 = vsel %vm49_vm0, %v47_v7, 0 }
   0x4   :  { %v8460_v9 = vand.u32 4294901760, %v51_v6  ;;  %v8462_v11 = vand.u32 4294901760, %v48_v8  ;;  %575 = vmatprep.subr.mxu1 %v8449_v3  ;;  %v8466_v12 = vsub.f32 %v548_v1, %v8451_v4  ;;  %v664_v13 = vsub.f32 %v549_v0, %v8449_v3 }
   0x5   :  { %v8469_v14 = vand.u32 4294901760, %v54_v10 }
   0x6   :  { %17 = vsyncpa [#allocation5], 0  ;;  %577 = vmatpush1.msra.mxu1 %v8451_v4  ;;  %v8473_v15 = vsub.f32 %v51_v6, %v8460_v9  ;;  %6539 = vmatprep.subr.mxu0 %v8462_v11  ;;  %v144_v16 = vsub.f32 %v48_v8, %v8462_v11  ;;  %v665_v17 = vand.u32 4294901760, %v664_v13  ;;  %v671_v18 = vand.u32 4294901760, %v8466_v12  ;;  %v551_v33 = vld [vmem:[%s9904_s4 + $0x18] sm:$0xff]  ;;  %v550_v36 = vld [vmem:[%s9904_s4 + $0x10] sm:$0xff] }
   0x7   :  { %v8479_v19 = vsub.f32 %v54_v10, %v8469_v14  ;;  %6540 = vmatpush3.msra.mxu0 %v8462_v11  ;;  %v8517_v34 = vand.u32 4294901760, %v551_v33  ;;  %v1090_v37 = vand.u32 4294901760, %v550_v36  ;;  %v554_v45 = vlaneseq  ;;  %v552_v48 = vld [vmem:[%s9905_s5] sm:$0xf]  ;;  %s8372_s29 = smov [#allocation4]  }
   0x8   :  { %v8483_v20 = vand.u32 4294901760, %v8473_v15  ;;  %v145_v21 = vand.u32 4294901760, %v144_v16  ;;  %v666_v22 = vsub.f32 %v664_v13, %v665_v17  ;;  %v672_v23 = vsub.f32 %v8466_v12, %v671_v18  ;;  %s6014_s30 = sshll.u32 %s8372_s29, 4  ;;  %s6015_s30 = int_to_ptr.vmem [resolvable:$true] %s6014_s30 }
   0x9   :  { %v8487_v24 = vand.u32 4294901760, %v8479_v19  ;;  %v1178_v35 = vsub.f32 %v551_v33, %v8517_v34  ;;  %v1184_v39 = vsub.f32 %v550_v36, %v1090_v37  ;;  %v555_v46 = vshrl.u32 %v554_v45, 7  ;;  %s8347_s1 = scalar_lea.vmem %s6015_s30, 256  ;;  %p8352_p1 = scmp.lt.s32.totalorder %s6015_s30, %s6015_s30 }
   0xa   :  { %v125_v25 = vsub.f32 %v8473_v15, %v8483_v20  ;;  %v146_v26 = vsub.f32 %v144_v16, %v145_v21  ;;  %v667_v27 = vand.u32 4294901760, %v666_v22  ;;  %v673_v28 = vand.u32 4294901760, %v672_v23  ;;  %p8348_p0 = scmp.ne.s32.totalorder %s6015_s30, %s8347_s1  ;;  %p8353_p2 = scmp.lt.s32.totalorder %s8347_s1, %s8347_s1 }
   0xb   :  { %v135_v29 = vsub.f32 %v8479_v19, %v8487_v24  ;;  %v1179_v38 = vand.u32 4294901760, %v1178_v35  ;;  %v1185_v41 = vand.u32 4294901760, %v1184_v39  ;;  %v560_v47 = vsub.s32 1, %v555_v46 }
   0xc   :  { %v8493_v30 = vand.u32 4294901760, %v125_v25  ;;  %668 = vmatprep.subr.mxu1 %v667_v27  ;;  %v147_v31 = vand.u32 4294901760, %v146_v26  ;;  %v556_v49 = vsub.s32 0, %v555_v46  ;;  %vm545_vm1 = vcmask 261120   ;;  %p8354_p3 = por %p8353_p2, %p8352_p1 }
   0xd   :  { %v8496_v32 = vand.u32 4294901760, %v135_v29  ;;  %v1180_v40 = vsub.f32 %v1178_v35, %v1179_v38  ;;  %v1186_v43 = vsub.f32 %v1184_v39, %v1185_v41  ;;  %v561_v50 = vrot.slane %v552_v48, %v560_v47 }
   0xe   :  { %646 = vmatmul.mubr.f32.vlgmr.msra.gmra.mrb[0].mxu1 %v8493_v30  ;;  %6541 = vmatprep.mubr.f32.mxu0 %v8493_v30  ;;  %v557_v51 = vrot.slane %v552_v48, %v556_v49  ;;  %v568_v22 = vsub.s32 3, %v555_v46  ;;  %vm1642_vm2 = vcmask 130048   ;;  %p8355_p4 = pnand %p8354_p3, %p8348_p0 }
   0xf   :  { %674 = vmatpush1.msra.mxu1 %v673_v28  ;;  %651 = vmatprep.mubr.f32.mxu1 %v8371_v5  ;;  %v1181_v42 = vand.u32 4294901760, %v1180_v40  ;;  %v1187_v44 = vand.u32 4294901760, %v1186_v43 }
  0x10   :  { %754 = vmatprep.subr.mxu1 %v664_v13  ;;  %6542 = vmatmul.mubr.f32.vlgmr.msra.gmra.mrb[0].mxu0 %v8496_v32 }
  0x11   :  { %6544 = vmatprep.subr.mxu0 %v147_v31  ;;  %6546 = vmatprep.mubr.f32.mxu0 %v8460_v9 }
  0x12   :  { %657 = vmatmul.mubr.f32.gmra.mrb[2].mxu1 %v8496_v32  ;;  %6545 = vmatpush3.msra.mxu0 %v147_v31 }
  0x13   :  { %737 = vmatprep.mubr.f32.mxu1 %v8371_v5  ;;  %6549 = vmatprep.subr.mxu0 %v144_v16 }
  0x16   :  { %739 = vmatmul.mubr.f32.vlgmr.msra.gmra.mrb[0].mxu1 %v8460_v9 }
  0x17   :  { %757 = vmatpush1.msra.mxu1 %v8466_v12  ;;  %744 = vmatprep.mubr.f32.mxu1 %v8371_v5 }
  0x18   :  { %838 = vmatprep.subr.mxu1 %v8449_v3  ;;  %6547 = vmatmul.mubr.f32.vlgmr.msra.gmra.mrb[0].mxu0 %v8469_v14 }
  0x19   :  { %6550 = vmatpush3.msra.mxu0 %v144_v16  ;;  %6551 = vmatprep.mubr.f32.mxu0 %v8473_v15 }
  0x1a   :  { %746 = vmatmul.mubr.f32.gmra.mrb[2].mxu1 %v8469_v14  ;;  %6554 = vmatprep.subr.mxu0 %v8462_v11 }
  0x1b   :  { %820 = vmatprep.mubr.f32.mxu1 %v8371_v5 }
  0x1e   :  { %823 = vmatmul.mubr.f32.vlgmr.msra.gmra.mrb[0].mxu1 %v8473_v15 }
  0x1f   :  { %840 = vmatpush1.msra.mxu1 %v8451_v4  ;;  %828 = vmatprep.mubr.f32.mxu1 %v8371_v5 }
  0x20   :  { %925 = vmatprep.subr.mxu1 %v665_v17  ;;  %6552 = vmatmul.mubr.f32.vlgmr.msra.gmra.mrb[0].mxu0 %v8479_v19 }
  0x21   :  { %6555 = vmatpush3.msra.mxu0 %v8462_v11  ;;  %6556 = vmatprep.mubr.f32.mxu0 %v8483_v20 }
  0x22   :  { %831 = vmatmul.mubr.f32.gmra.mrb[2].mxu1 %v8479_v19  ;;  %6559 = vmatprep.subr.mxu0 %v145_v21 }
  0x23   :  { %903 = vmatprep.mubr.f32.mxu1 %v8371_v5 }
  0x26   :  { %907 = vmatmul.mubr.f32.vlgmr.msra.gmra.mrb[0].mxu1 %v8483_v20 }
  0x27   :  { %929 = vmatpush1.msra.mxu1 %v671_v18  ;;  %912 = vmatprep.mubr.f32.mxu1 %v8371_v5 }
  0x28   :  { %1008 = vmatprep.subr.mxu1 %v8449_v3  ;;  %6557 = vmatmul.mubr.f32.vlgmr.msra.gmra.mrb[0].mxu0 %v8487_v24 }
  0x29   :  { %6560 = vmatpush3.msra.mxu0 %v145_v21  ;;  %6561 = vmatprep.mubr.f32.mxu0 %v8460_v9  ;;  %v564_v21 = vsub.s32 2, %v555_v46 }
  0x2a   :  { %916 = vmatmul.mubr.f32.gmra.mrb[2].mxu1 %v8487_v24  ;;  %6564 = vmatprep.subr.mxu0 %v8462_v11 }
  0x2b   :  { %992 = vmatprep.mubr.f32.mxu1 %v8371_v5  ;;  %v565_v23 = vrot.slane %v552_v48, %v564_v21 }
  0x2e   :  { %994 = vmatmul.mubr.f32.vlgmr.msra.gmra.mrb[0].mxu1 %v8460_v9 }
  0x2f   :  { %1010 = vmatpush1.msra.mxu1 %v8451_v4  ;;  %999 = vmatprep.mubr.f32.mxu1 %v8371_v5 }
  0x30   :  { %6562 = vmatmul.mubr.f32.vlgmr.msra.gmra.mrb[0].mxu0 %v8469_v14  ;;  %1089 = vmatprep.subr.mxu1 %v8517_v34 }
  0x31   :  { %6565 = vmatpush3.msra.mxu0 %v8462_v11  ;;  %6566 = vmatprep.mubr.f32.mxu0 %v8460_v9 }
  0x32   :  { %1001 = vmatmul.mubr.f32.gmra.mrb[2].mxu1 %v8469_v14  ;;  %1182 = vmatprep.subr.mxu0 %v1181_v42 }
  0x33   :  { %1073 = vmatprep.mubr.f32.mxu1 %v8371_v5 }
  0x36   :  { %1075 = vmatmul.mubr.f32.vlgmr.msra.gmra.mrb[0].mxu1 %v8460_v9 }
  0x37   :  { %1080 = vmatprep.mubr.f32.mxu1 %v8371_v5  ;;  %1091 = vmatpush1.msra.mxu1 %v1090_v37 }
  0x38   :  { %6567 = vmatmul.mubr.f32.vlgmr.msra.gmra.mrb[0].mxu0 %v8469_v14 }
  0x39   :  { %1188 = vmatpush1.msra.mxu0 %v1187_v44  ;;  %1251 = vmatprep.mubr.f32.mxu0 %v8371_v5 }
  0x3a   :  { %1082 = vmatmul.mubr.f32.gmra.mrb[2].mxu1 %v8469_v14  ;;  %1268 = vmatprep.subr.mxu0 %v1178_v35 }
  0x3b   :  { %1154 = vmatprep.mubr.f32.mxu1 %v8371_v5 }
  0x3c   :  { %1253 = vmatmul.mubr.f32.vlgmr.msra.gmra.mrb[2].mxu0 %v8460_v9 }
  0x3d   :  { %1258 = vmatprep.mubr.f32.mxu0 %v8371_v5  ;;  %1271 = vmatpush1.msra.mxu0 %v1184_v39 }
  0x3e   :  { %1352 = vmatprep.subr.mxu0 %v8517_v34  ;;  %1160 = vmatmul.mubr.f32.vlgmr.msra.gmra.mrb[4].mxu1 %v8493_v30 }
  0x3f   :  { %1165 = vmatprep.mubr.f32.mxu1 %v8371_v5 }
  0x40   :  { %1260 = vmatmul.mubr.f32.gmra.mrb[4].mxu0 %v8469_v14 }
  0x41   :  { %1334 = vmatprep.mubr.f32.mxu0 %v8371_v5 }
  0x42   :  { %1171 = vmatmul.mubr.f32.gmra.mrb[6].mxu1 %v8496_v32 }
  0x44   :  { %1337 = vmatmul.mubr.f32.vlgmr.msra.gmra.mrb[2].mxu0 %v8473_v15 }
  0x45   :  { %1342 = vmatprep.mubr.f32.mxu0 %v8371_v5  ;;  %1354 = vmatpush1.msra.mxu0 %v1090_v37 }
  0x46   :  { %1439 = vmatprep.subr.mxu0 %v1179_v38 }
  0x48   :  { %1345 = vmatmul.mubr.f32.gmra.mrb[4].mxu0 %v8479_v19 }
  0x49   :  { %1417 = vmatprep.mubr.f32.mxu0 %v8371_v5 }
  0x4c   :  { %1421 = vmatmul.mubr.f32.vlgmr.msra.gmra.mrb[2].mxu0 %v8483_v20 }
  0x4d   :  { %1426 = vmatprep.mubr.f32.mxu0 %v8371_v5  ;;  %1443 = vmatpush1.msra.mxu0 %v1185_v41 }
  0x4e   :  { %1522 = vmatprep.subr.mxu0 %v8517_v34 }
  0x50   :  { %1430 = vmatmul.mubr.f32.gmra.mrb[4].mxu0 %v8487_v24  ;;  %v569_v24 = vrot.slane %v552_v48, %v568_v22 }
  0x51   :  { %1506 = vmatprep.mubr.f32.mxu0 %v8371_v5 }
  0x54   :  { %1508 = vmatmul.mubr.f32.vlgmr.msra.gmra.mrb[2].mxu0 %v8460_v9 }
  0x55   :  { %1513 = vmatprep.mubr.f32.mxu0 %v8371_v5  ;;  %1524 = vmatpush1.msra.mxu0 %v1090_v37 }
  0x58   :  { %1515 = vmatmul.mubr.f32.gmra.mrb[4].mxu0 %v8469_v14 }
  0x59   :  { %1587 = vmatprep.mubr.f32.mxu0 %v8371_v5 }
  0x5c   :  { %1589 = vmatmul.mubr.f32.vlgmr.msra.gmra.mrb[2].mxu0 %v8460_v9 }
  0x5d   :  { %1594 = vmatprep.mubr.f32.mxu0 %v8371_v5 }
  0x60   :  { %1596 = vmatmul.mubr.f32.gmra.mrb[4].mxu0 %v8469_v14 }
 0x109   :  { %v1076_v52 = vpop.f32.mrb[0].mxu1 }
 0x10a   :  { %v1078_v53 = vpop.f32.mrb[1].mxu1  ;;  %v8147_v56 = vadd.f32 %v1076_v52, %v557_v51 }
 0x10b   :  { %v8148_v54 = vadd.f32 %v1078_v53, %v561_v50  ;;  %v6568_v55 = vpop.f32.mrb[0].mxu0 }
 0x10c   :  { %547 = vst.msk [vmem:[#allocation2 + $0x8] sm:$0xff] %vm545_vm1, %v6568_v55  ;;  %v535_v57 = vpop.f32.mrb[1].mxu0  ;;  %v8582_v63 = vmax.f32 %v8147_v56, 0.0 }
 0x10d   :  { %v1603_v58 = vmax.f32 %v8148_v54, 0.0  ;;  %v1083_v59 = vpop.f32.mrb[2].mxu1  ;;  %546 = vst.msk [vmem:[#allocation2] sm:$0xff] %vm545_vm1, %v535_v57 }
 0x10e   :  { %v8149_v60 = vadd.f32 %v1083_v59, %v557_v51  ;;  %v1085_v61 = vpop.f32.mrb[3].mxu1 }
 0x10f   :  { %v8150_v62 = vadd.f32 %v1085_v61, %v561_v50  ;;  %1610 = vxpose.xlu0.b32.start [1/2] (short) %v1603_v58, 128 }
 0x110   :  { %v8584_v0 = vmax.f32 %v8149_v60, 0.0 }
 0x111   :  { %v1607_v1 = vmax.f32 %v8150_v62, 0.0  ;;  %v1161_v2 = vpop.f32.mrb[4].mxu1 }
 0x112   :  { %v3479_v3 = vadd.f32 %v8584_v0, %v8582_v63  ;;  %v1163_v4 = vpop.f32.mrb[5].mxu1  ;;  %v1162_v25 = vadd.f32 %v1161_v2, %v565_v23 }
 0x113   :  { %v3486_v5 = vadd.f32 %v1607_v1, %v1603_v58  ;;  %1611 = vxpose.xlu0.b32.end [2/2] (short) %v1607_v1, 128  ;;  %v1164_v26 = vadd.f32 %v1163_v4, %v569_v24 }
 0x114   :  { %v3480_v6 = vrot.slane %v3479_v3, 4 }
 0x115   :  { %v3487_v7 = vrot.slane %v3486_v5, 4  ;;  %v1172_v8 = vpop.f32.mrb[6].mxu1 }
 0x116   :  { %v3481_v9 = vadd.f32 %v3480_v6, %v3479_v3  ;;  %v1174_v10 = vpop.f32.mrb[7].mxu1  ;;  %v1173_v28 = vadd.f32 %v1172_v8, %v565_v23 }
 0x117   :  { %v3488_v11 = vadd.f32 %v3487_v7, %v3486_v5  ;;  %v1175_v32 = vadd.f32 %v1174_v10, %v569_v24 }
 0x118   :  { %v3482_v12 = vrot.slane %v3481_v9, 2 }
 0x119   :  { %v3489_v13 = vrot.slane %v3488_v11, 2 }
 0x11a   :  { %v3483_v14 = vadd.f32 %v3482_v12, %v3481_v9 }
 0x11b   :  { %v3490_v15 = vadd.f32 %v3489_v13, %v3488_v11 }
 0x11c   :  { %v3484_v16 = vrot.slane %v3483_v14, 1 }
 0x11d   :  { %v3491_v17 = vrot.slane %v3490_v15, 1 }
 0x11e   :  { %v3485_v18 = vadd.f32 %v3484_v16, %v3483_v14 }
 0x11f   :  { %v3492_v19 = vadd.f32 %v3491_v17, %v3490_v15 }
 0x121   :  { %v3493_v20 = vmul.f32 %v3492_v19, %v3485_v18 }
 0x123   :  { %3494 = vadd.xlane.f32.xlu1 %v3493_v20 }
 0x12f   :  { %v1590_v27 = vpop.f32.mrb[2].mxu0 }
 0x130   :  { %v8152_v29 = vadd.f32 %v1590_v27, %v1162_v25  ;;  %v1592_v30 = vpop.f32.mrb[3].mxu0 }
 0x131   :  { %v8588_v31 = vadd.f32 %v1592_v30, %v1164_v26 }
 0x132   :  { %v1604_v33 = vmax.f32 %v8152_v29, 0.0 }
 0x133   :  { %v1597_v34 = vpop.f32.mrb[4].mxu0 }
 0x134   :  { %v1692_v35 = vand.u32 4294901760, %v1604_v33  ;;  %v8156_v36 = vadd.f32 %v1597_v34, %v1173_v28  ;;  %v1599_v37 = vpop.f32.mrb[5].mxu0 }
 0x135   :  { %v8590_v38 = vadd.f32 %v1599_v37, %v1175_v32 }
 0x136   :  { %v1920_v39 = vsub.f32 %v1604_v33, %v1692_v35  ;;  %v1608_v40 = vmax.f32 %v8156_v36, 0.0 }
 0x138   :  { %v1921_v41 = vand.u32 4294901760, %v1920_v39  ;;  %v1695_v42 = vand.u32 4294901760, %v1608_v40 }
 0x13a   :  { %v8592_v43 = vpack.c.bf16 %v1695_v42, %v1692_v35  ;;  %v1927_v44 = vsub.f32 %v1608_v40, %v1695_v42  ;;  %v1922_v45 = vsub.f32 %v1920_v39, %v1921_v41 }
 0x13c   :  { %v1928_v46 = vand.u32 4294901760, %v1927_v44  ;;  %7476 = vmatprep.subr.bf16.mxu0 %v8592_v43  ;;  %v7483_v47 = vpack.c.bf16 %v1927_v44, %v1920_v39  ;;  %v1923_v48 = vand.u32 4294901760, %v1922_v45 }
 0x13d   :  { %7478 = vmatpush3.bf16.msra.mxu0 %v8592_v43 }
 0x13e   :  { %v1929_v49 = vsub.f32 %v1927_v44, %v1928_v46  ;;  %v8596_v50 = vpack.c.bf16 %v1928_v46, %v1921_v41 }
 0x140   :  { %v1930_v51 = vand.u32 4294901760, %v1929_v49 }
 0x142   :  { %v7479_v52 = vpack.c.bf16 %v1930_v51, %v1923_v48 }
 0x144   :  { %7480 = vmatprep.subr.bf16.mxu1 %v7479_v52 }
 0x145   :  { %7482 = vmatpush3.bf16.msra.mxu1 %v7479_v52 }
 0x146   :  { %7484 = vmatprep.subr.bf16.mxu1 %v7483_v47 }
 0x18f   :  { %v1626_v53 = vpop.trf.xlu0 }
 0x190   :  { %v1644_v54 = vsel %vm1642_vm2, %v1626_v53, 0 }
 0x191   :  { %v8599_v55 = vand.u32 4294901760, %v1644_v54 }
 0x193   :  { %v8602_v56 = vsub.f32 %v1644_v54, %v8599_v55  ;;  %6601 = vmatprep.mubr.f32.mxu1 %v8599_v55  ;;  %v1627_v57 = vpop.trf.xlu0 }
 0x194   :  { %v1647_v58 = vsel %vm1642_vm2, %v1627_v57, 0 }
 0x195   :  { %v1760_v59 = vand.u32 4294901760, %v8602_v56  ;;  %v8607_v60 = vand.u32 4294901760, %v1647_v58 }
 0x197   :  { %v8610_v61 = vsub.f32 %v1647_v58, %v8607_v60  ;;  %v1628_v62 = vpop.trf.xlu0  ;;  %6602 = vmatmul.mubr.f32.vlgmr.msra.gmra.mrb[8].mxu1 %v8607_v60  ;;  %v1761_v1 = vsub.f32 %v8602_v56, %v1760_v59 }
 0x198   :  { %v1650_v2 = vsel %vm1642_vm2, %v1628_v62, 0  ;;  %7486 = vmatpush3.bf16.msra.mxu1 %v7483_v47 }
 0x199   :  { %v1770_v3 = vand.u32 4294901760, %v8610_v61  ;;  %v8618_v4 = vand.u32 4294901760, %v1650_v2  ;;  %7488 = vmatprep.subr.bf16.mxu1 %v8592_v43  ;;  %v1762_v5 = vand.u32 4294901760, %v1761_v1 }
 0x19b   :  { %v1771_v6 = vsub.f32 %v8610_v61, %v1770_v3  ;;  %v8625_v7 = vsub.f32 %v1650_v2, %v8618_v4  ;;  %v1629_v8 = vpop.trf.xlu0  ;;  %6573 = vmatprep.mubr.f32.mxu0 %v1762_v5  ;;  %6604 = vmatprep.mubr.f32.mxu1 %v8618_v4 }
 0x19c   :  { %v1653_v9 = vsel %vm1642_vm2, %v1629_v8, 0 }
 0x19d   :  { %v1772_v10 = vand.u32 4294901760, %v1771_v6  ;;  %v1780_v11 = vand.u32 4294901760, %v8625_v7  ;;  %v8630_v12 = vand.u32 4294901760, %v1653_v9 }
 0x19f   :  { %v8633_v13 = vsub.f32 %v1653_v9, %v8630_v12  ;;  %v1630_v14 = vpop.trf.xlu0  ;;  %6574 = vmatmul.mubr.f32.vlgmr.msra.gmra.mrb[6].mxu0 %v1772_v10  ;;  %6605 = vmatmul.mubr.f32.gmra.mrb[10].mxu1 %v8630_v12  ;;  %v1781_v15 = vsub.f32 %v8625_v7, %v1780_v11 }
 0x1a0   :  { %v1656_v16 = vsel %vm1642_vm2, %v1630_v14, 0 }
 0x1a1   :  { %v1790_v17 = vand.u32 4294901760, %v8633_v13  ;;  %v8641_v18 = vand.u32 4294901760, %v1656_v16  ;;  %v1782_v19 = vand.u32 4294901760, %v1781_v15 }
 0x1a3   :  { %v8644_v20 = vsub.f32 %v1656_v16, %v8641_v18  ;;  %v1631_v21 = vpop.trf.xlu0  ;;  %6576 = vmatprep.mubr.f32.mxu0 %v1782_v19  ;;  %6607 = vmatprep.mubr.f32.mxu1 %v8641_v18  ;;  %v1791_v22 = vsub.f32 %v8633_v13, %v1790_v17 }
 0x1a4   :  { %v1659_v23 = vsel %vm1642_vm2, %v1631_v21, 0 }
 0x1a5   :  { %v1800_v24 = vand.u32 4294901760, %v8644_v20  ;;  %v8652_v25 = vand.u32 4294901760, %v1659_v23  ;;  %v1792_v26 = vand.u32 4294901760, %v1791_v22 }
 0x1a7   :  { %v8655_v27 = vsub.f32 %v1659_v23, %v8652_v25  ;;  %v1632_v28 = vpop.trf.xlu0  ;;  %6577 = vmatmul.mubr.f32.gmra.mrb[8].mxu0 %v1792_v26  ;;  %6608 = vmatmul.mubr.f32.gmra.mrb[12].mxu1 %v8652_v25  ;;  %v1801_v29 = vsub.f32 %v8644_v20, %v1800_v24 }
 0x1a8   :  { %v1662_v30 = vsel %vm1642_vm2, %v1632_v28, 0 }
 0x1a9   :  { %v1810_v32 = vand.u32 4294901760, %v8655_v27  ;;  %v8663_v33 = vand.u32 4294901760, %v1662_v30  ;;  %v1802_v34 = vand.u32 4294901760, %v1801_v29 }
 0x1ab   :  { %v8666_v35 = vsub.f32 %v1662_v30, %v8663_v33  ;;  %v1633_v36 = vpop.trf.xlu0  ;;  %6579 = vmatprep.mubr.f32.mxu0 %v1802_v34  ;;  %6610 = vmatprep.mubr.f32.mxu1 %v8663_v33  ;;  %v1811_v37 = vsub.f32 %v8655_v27, %v1810_v32 }
 0x1ac   :  { %v1665_v39 = vsel %vm1642_vm2, %v1633_v36, 0 }
 0x1ad   :  { %v1820_v40 = vand.u32 4294901760, %v8666_v35  ;;  %v8674_v41 = vand.u32 4294901760, %v1665_v39  ;;  %v1812_v42 = vand.u32 4294901760, %v1811_v37 }
 0x1af   :  { %v8677_v44 = vsub.f32 %v1665_v39, %v8674_v41  ;;  %v1634_v45 = vpop.trf.xlu0  ;;  %6580 = vmatmul.mubr.f32.gmra.mrb[10].mxu0 %v1812_v42  ;;  %6611 = vmatmul.mubr.f32.gmra.mrb[14].mxu1 %v8674_v41  ;;  %v1821_v46 = vsub.f32 %v8666_v35, %v1820_v40 }
 0x1b0   :  { %v1668_v47 = vsel %vm1642_vm2, %v1634_v45, 0  ;;  %v3495_v48 = vpop.xlane.xlu1 %3494 }
 0x1b1   :  { %v1830_v49 = vand.u32 4294901760, %v8677_v44  ;;  %v8685_v51 = vand.u32 4294901760, %v1668_v47  ;;  %8337 = vpush %v3495_v48  ;;  %v1822_v52 = vand.u32 4294901760, %v1821_v46 }
 0x1b3   :  { %v8688_v53 = vsub.f32 %v1668_v47, %v8685_v51  ;;  %v1635_v54 = vpop.trf.xlu0  ;;  %6582 = vmatprep.mubr.f32.mxu0 %v1822_v52  ;;  %6613 = vmatprep.mubr.f32.mxu1 %v8685_v51  ;;  %v1831_v57 = vsub.f32 %v8677_v44, %v1830_v49 }
 0x1b4   :  { %v1671_v58 = vsel %vm1642_vm2, %v1635_v54, 0 }
 0x1b5   :  { %v1840_v62 = vand.u32 4294901760, %v8688_v53  ;;  %v8696_v1 = vand.u32 4294901760, %v1671_v58  ;;  %v1832_v2 = vand.u32 4294901760, %v1831_v57 }
 0x1b7   :  { %v8699_v5 = vsub.f32 %v1671_v58, %v8696_v1  ;;  %v1636_v6 = vpop.trf.xlu0  ;;  %6583 = vmatmul.mubr.f32.gmra.mrb[12].mxu0 %v1832_v2  ;;  %6614 = vmatmul.mubr.f32.gmra.mrb[16].mxu1 %v8696_v1  ;;  %v1841_v8 = vsub.f32 %v8688_v53, %v1840_v62  ;;  %v8743_v58 = vand.u32 4294901760, %v8582_v63 }
 0x1b8   :  { %v1674_v9 = vsel %vm1642_vm2, %v1636_v6, 0 }
 0x1b9   :  { %v1850_v10 = vand.u32 4294901760, %v8699_v5  ;;  %v8707_v14 = vand.u32 4294901760, %v1674_v9  ;;  %v1842_v15 = vand.u32 4294901760, %v1841_v8 }
 0x1bb   :  { %v8710_v16 = vsub.f32 %v1674_v9, %v8707_v14  ;;  %v1637_v19 = vpop.trf.xlu0  ;;  %6585 = vmatprep.mubr.f32.mxu0 %v1842_v15  ;;  %6616 = vmatprep.mubr.f32.mxu1 %v8707_v14  ;;  %v1851_v21 = vsub.f32 %v8699_v5, %v1850_v10 }
 0x1bc   :  { %v1677_v22 = vsel %vm1642_vm2, %v1637_v19, 0 }
 0x1bd   :  { %v1860_v23 = vand.u32 4294901760, %v8710_v16  ;;  %v8718_v26 = vand.u32 4294901760, %v1677_v22  ;;  %v1852_v28 = vand.u32 4294901760, %v1851_v21 }
 0x1bf   :  { %v8721_v29 = vsub.f32 %v1677_v22, %v8718_v26  ;;  %v1638_v30 = vpop.trf.xlu0  ;;  %6586 = vmatmul.mubr.f32.gmra.mrb[14].mxu0 %v1852_v28  ;;  %6617 = vmatmul.mubr.f32.gmra.mrb[18].mxu1 %v8718_v26  ;;  %v1861_v34 = vsub.f32 %v8710_v16, %v1860_v23  ;;  %v8758_v22 = vsub.f32 %v8582_v63, %v8743_v58 }
 0x1c0   :  { %v1680_v36 = vsel %vm1642_vm2, %v1638_v30, 0 }
 0x1c1   :  { %v1870_v37 = vand.u32 4294901760, %v8721_v29  ;;  %v8729_v39 = vand.u32 4294901760, %v1680_v36  ;;  %v1862_v42 = vand.u32 4294901760, %v1861_v34  ;;  %v2878_v63 = vand.u32 4294901760, %v8758_v22 }
 0x1c3   :  { %v8732_v45 = vsub.f32 %v1680_v36, %v8729_v39  ;;  %v1639_v46 = vpop.trf.xlu0  ;;  %6588 = vmatprep.mubr.f32.mxu0 %v1862_v42  ;;  %6619 = vmatprep.mubr.f32.mxu1 %v8729_v39  ;;  %v1871_v47 = vsub.f32 %v8721_v29, %v1870_v37 }
 0x1c4   :  { %v1683_v48 = vsel %vm1642_vm2, %v1639_v46, 0 }
 0x1c5   :  { %v1880_v52 = vand.u32 4294901760, %v8732_v45  ;;  %v8740_v54 = vand.u32 4294901760, %v1683_v48  ;;  %v1872_v57 = vand.u32 4294901760, %v1871_v47 }
 0x1c7   :  { %v8746_v2 = vsub.f32 %v1683_v48, %v8740_v54  ;;  %v1640_v6 = vpop.trf.xlu0  ;;  %6589 = vmatmul.mubr.f32.gmra.mrb[16].mxu0 %v1872_v57  ;;  %6620 = vmatmul.mubr.f32.gmra.mrb[20].mxu1 %v8740_v54  ;;  %v1881_v8 = vsub.f32 %v8732_v45, %v1880_v52 }
 0x1c8   :  { %v1686_v9 = vsel %vm1642_vm2, %v1640_v6, 0 }
 0x1c9   :  { %v1890_v15 = vand.u32 4294901760, %v8746_v2  ;;  %v8754_v19 = vand.u32 4294901760, %v1686_v9  ;;  %v1882_v21 = vand.u32 4294901760, %v1881_v8 }
 0x1cb   :  { %v8761_v28 = vsub.f32 %v1686_v9, %v8754_v19  ;;  %v1641_v30 = vpop.trf.xlu0  ;;  %6591 = vmatprep.mubr.f32.mxu0 %v1882_v21  ;;  %6622 = vmatprep.mubr.f32.mxu1 %v8754_v19  ;;  %v1891_v34 = vsub.f32 %v8746_v2, %v1890_v15  ;;  %v2879_v9 = vsub.f32 %v8758_v22, %v2878_v63 }
 0x1cc   :  { %v1689_v36 = vsel %vm1642_vm2, %v1641_v30, 0 }
 0x1cd   :  { %v1900_v42 = vand.u32 4294901760, %v8761_v28  ;;  %v8769_v46 = vand.u32 4294901760, %v1689_v36  ;;  %v1892_v47 = vand.u32 4294901760, %v1891_v34  ;;  %v2880_v34 = vand.u32 4294901760, %v2879_v9 }
 0x1cf   :  { %v1909_v48 = vsub.f32 %v1689_v36, %v8769_v46  ;;  %6592 = vmatmul.mubr.f32.gmra.mrb[18].mxu0 %v1892_v47  ;;  %6623 = vmatmul.mubr.f32.gmra.mrb[22].mxu1 %v8769_v46  ;;  %v1901_v57 = vsub.f32 %v8761_v28, %v1900_v42 }
 0x1d0   :  { %6629 = vmatprep.mubr.f32.mxu1 %v8602_v56 }
 0x1d1   :  { %v1910_v6 = vand.u32 4294901760, %v1909_v48  ;;  %v1902_v8 = vand.u32 4294901760, %v1901_v57 }
 0x1d3   :  { %6594 = vmatprep.mubr.f32.mxu0 %v1902_v8  ;;  %6630 = vmatmul.mubr.f32.vlgmr.msra.gmra.mrb[8].mxu1 %v8610_v61  ;;  %v1911_v21 = vsub.f32 %v1909_v48, %v1910_v6 }
 0x1d4   :  { %7490 = vmatpush3.bf16.msra.mxu1 %v8592_v43  ;;  %6632 = vmatprep.mubr.f32.mxu1 %v8625_v7 }
 0x1d5   :  { %7492 = vmatprep.subr.bf16.mxu1 %v8596_v50  ;;  %v1912_v30 = vand.u32 4294901760, %v1911_v21 }
 0x1d7   :  { %6595 = vmatmul.mubr.f32.gmra.mrb[20].mxu0 %v1912_v30  ;;  %6633 = vmatmul.mubr.f32.gmra.mrb[10].mxu1 %v8633_v13 }
 0x1d8   :  { %6635 = vmatprep.mubr.f32.mxu1 %v8644_v20  ;;  %6769 = vmatprep.mubr.f32.mxu0 %v2880_v34 }
 0x1db   :  { %6636 = vmatmul.mubr.f32.gmra.mrb[12].mxu1 %v8655_v27 }
 0x1dc   :  { %6638 = vmatprep.mubr.f32.mxu1 %v8666_v35 }
 0x1df   :  { %6639 = vmatmul.mubr.f32.gmra.mrb[14].mxu1 %v8677_v44 }
 0x1e0   :  { %6641 = vmatprep.mubr.f32.mxu1 %v8688_v53 }
 0x1e2   :  { %s8338_s5 = spop %8337 }
 0x1e3   :  { %s3499_s16 = smul.f32 0.0625, %s8338_s5  ;;  %6642 = vmatmul.mubr.f32.gmra.mrb[16].mxu1 %v8699_v5 }
 0x1e4   :  { %6644 = vmatprep.mubr.f32.mxu1 %v8710_v16 }
 0x1e5   :  { %s3500_s17 = sadd.f32 1e-06, %s3499_s16 }
 0x1e7   :  { %v3501_v36 = vstv %s3500_s17  ;;  %6645 = vmatmul.mubr.f32.gmra.mrb[18].mxu1 %v8721_v29 }
 0x1e8   :  { %8345 = vrcp.f32 %v3501_v36  ;;  %6647 = vmatprep.mubr.f32.mxu1 %v8732_v45 }
 0x1eb   :  { %6648 = vmatmul.mubr.f32.gmra.mrb[20].mxu1 %v8746_v2 }
 0x1ec   :  { %6650 = vmatprep.mubr.f32.mxu1 %v8761_v28 }
 0x1ef   :  { %6651 = vmatmul.mubr.f32.gmra.mrb[22].mxu1 %v1909_v48 }
 0x1f0   :  { %6657 = vmatprep.mubr.f32.mxu1 %v1760_v59 }
 0x1f2   :  { %v8346_v47 = vpop.eup %8345 }
 0x1f3   :  { %6658 = vmatmul.mubr.f32.vlgmr.msra.gmra.mrb[8].mxu1 %v1770_v3  ;;  %8339 = vpush %v8346_v47 }
 0x1f4   :  { %7494 = vmatpush3.bf16.msra.mxu1 %v8596_v50  ;;  %6660 = vmatprep.mubr.f32.mxu1 %v1780_v11 }
 0x1f5   :  { %7496 = vmatprep.subr.bf16.mxu1 %v8592_v43 }
 0x1f7   :  { %6661 = vmatmul.mubr.f32.gmra.mrb[10].mxu1 %v1790_v17 }
 0x1f8   :  { %6663 = vmatprep.mubr.f32.mxu1 %v1800_v24 }
 0x1fb   :  { %6664 = vmatmul.mubr.f32.gmra.mrb[12].mxu1 %v1810_v32 }
 0x1fc   :  { %6666 = vmatprep.mubr.f32.mxu1 %v1820_v40 }
 0x1ff   :  { %6667 = vmatmul.mubr.f32.gmra.mrb[14].mxu1 %v1830_v49 }
 0x200   :  { %6669 = vmatprep.mubr.f32.mxu1 %v1840_v62 }
 0x203   :  { %6670 = vmatmul.mubr.f32.gmra.mrb[16].mxu1 %v1850_v10 }
 0x204   :  { %6672 = vmatprep.mubr.f32.mxu1 %v1860_v23 }
 0x207   :  { %6673 = vmatmul.mubr.f32.gmra.mrb[18].mxu1 %v1870_v37 }
 0x208   :  { %6675 = vmatprep.mubr.f32.mxu1 %v1880_v52 }
 0x20b   :  { %6676 = vmatmul.mubr.f32.gmra.mrb[20].mxu1 %v1890_v15 }
 0x20c   :  { %6678 = vmatprep.mubr.f32.mxu1 %v1900_v42 }
 0x20f   :  { %6679 = vmatmul.mubr.f32.gmra.mrb[22].mxu1 %v1910_v6 }
 0x210   :  { %6685 = vmatprep.mubr.f32.mxu1 %v8599_v55 }
 0x213   :  { %6686 = vmatmul.mubr.f32.vlgmr.msra.gmra.mrb[8].mxu1 %v8607_v60 }
 0x214   :  { %7498 = vmatpush3.bf16.msra.mxu1 %v8592_v43  ;;  %6688 = vmatprep.mubr.f32.mxu1 %v8618_v4 }
 0x217   :  { %6689 = vmatmul.mubr.f32.gmra.mrb[10].mxu1 %v8630_v12 }
 0x218   :  { %6691 = vmatprep.mubr.f32.mxu1 %v8641_v18 }
 0x21b   :  { %6692 = vmatmul.mubr.f32.gmra.mrb[12].mxu1 %v8652_v25 }
 0x21c   :  { %6694 = vmatprep.mubr.f32.mxu1 %v8663_v33 }
 0x21f   :  { %6695 = vmatmul.mubr.f32.gmra.mrb[14].mxu1 %v8674_v41 }
 0x220   :  { %6697 = vmatprep.mubr.f32.mxu1 %v8685_v51 }
 0x223   :  { %6698 = vmatmul.mubr.f32.gmra.mrb[16].mxu1 %v8696_v1 }
 0x224   :  { %6700 = vmatprep.mubr.f32.mxu1 %v8707_v14 }
 0x227   :  { %6701 = vmatmul.mubr.f32.gmra.mrb[18].mxu1 %v8718_v26 }
 0x228   :  { %6703 = vmatprep.mubr.f32.mxu1 %v8729_v39 }
 0x22b   :  { %6704 = vmatmul.mubr.f32.gmra.mrb[20].mxu1 %v8740_v54 }
 0x22c   :  { %6706 = vmatprep.mubr.f32.mxu1 %v8754_v19 }
 0x22f   :  { %6707 = vmatmul.mubr.f32.gmra.mrb[22].mxu1 %v8769_v46 }
 0x230   :  { %6713 = vmatprep.mubr.f32.mxu1 %v8599_v55 }
 0x233   :  { %6714 = vmatmul.mubr.f32.vlgmr.msra.gmra.mrb[8].mxu1 %v8607_v60 }
 0x234   :  { %6716 = vmatprep.mubr.f32.mxu1 %v8618_v4 }
 0x237   :  { %6717 = vmatmul.mubr.f32.gmra.mrb[10].mxu1 %v8630_v12 }
 0x238   :  { %6719 = vmatprep.mubr.f32.mxu1 %v8641_v18 }
 0x23b   :  { %6720 = vmatmul.mubr.f32.gmra.mrb[12].mxu1 %v8652_v25 }
 0x23c   :  { %6722 = vmatprep.mubr.f32.mxu1 %v8663_v33 }
 0x23f   :  { %6723 = vmatmul.mubr.f32.gmra.mrb[14].mxu1 %v8674_v41  ;;  %v8875_v41 = vand.u32 4294901760, %v8584_v0 }
 0x240   :  { %6725 = vmatprep.mubr.f32.mxu1 %v8685_v51 }
 0x241   :  { %v8884_v29 = vsub.f32 %v8584_v0, %v8875_v41 }
 0x243   :  { %6726 = vmatmul.mubr.f32.gmra.mrb[16].mxu1 %v8696_v1  ;;  %v2888_v21 = vand.u32 4294901760, %v8884_v29 }
 0x244   :  { %6728 = vmatprep.mubr.f32.mxu1 %v8707_v14 }
 0x247   :  { %6729 = vmatmul.mubr.f32.gmra.mrb[18].mxu1 %v8718_v26 }
 0x248   :  { %6731 = vmatprep.mubr.f32.mxu1 %v8729_v39 }
 0x24b   :  { %6732 = vmatmul.mubr.f32.gmra.mrb[20].mxu1 %v8740_v54 }
 0x24c   :  { %6734 = vmatprep.mubr.f32.mxu1 %v8754_v19 }
 0x24f   :  { %6735 = vmatmul.mubr.f32.gmra.mrb[22].mxu1 %v8769_v46 }
 0x272   :  { %v6575_v43 = vpop.f32.mrb[6].mxu0 }
 0x273   :  { %v1764_v50 = vpop.f32.mrb[7].mxu0 }
 0x27a   :  { %v6578_v55 = vpop.f32.mrb[8].mxu0 }
 0x27b   :  { %v1784_v56 = vpop.f32.mrb[9].mxu0 }
 0x282   :  { %v6581_v59 = vpop.f32.mrb[10].mxu0 }
 0x283   :  { %v1804_v60 = vpop.f32.mrb[11].mxu0 }
 0x28a   :  { %v6584_v61 = vpop.f32.mrb[12].mxu0 }
 0x28b   :  { %v1824_v3 = vpop.f32.mrb[13].mxu0 }
 0x292   :  { %v8858_v4 = vpop.f32.mrb[14].mxu0 }
 0x293   :  { %v8860_v7 = vpop.f32.mrb[15].mxu0 }
 0x29a   :  { %v8862_v11 = vpop.f32.mrb[16].mxu0 }
 0x29b   :  { %v8864_v12 = vpop.f32.mrb[17].mxu0 }
 0x2a2   :  { %v8866_v13 = vpop.f32.mrb[18].mxu0 }
 0x2a3   :  { %v8868_v17 = vpop.f32.mrb[19].mxu0 }
 0x2aa   :  { %v8870_v18 = vpop.f32.mrb[20].mxu0 }
 0x2ab   :  { %v8872_v20 = vpop.f32.mrb[21].mxu0 }
 0x306   :  { %v6715_v24 = vpop.f32.mrb[8].mxu1 }
 0x307   :  { %v8159_v25 = vadd.f32 %v6715_v24, %v6575_v43  ;;  %v2701_v27 = vpop.f32.mrb[9].mxu1 }
 0x308   :  { %v8160_v32 = vadd.f32 %v2701_v27, %v1764_v50 }
 0x309   :  { %v2799_v33 = vand.u32 4294901760, %v8159_v25 }
 0x30a   :  { %v2796_v35 = vand.u32 4294901760, %v8160_v32  ;;  %v6718_v40 = vpop.f32.mrb[10].mxu1 }
 0x30b   :  { %v2905_v44 = vsub.f32 %v8159_v25, %v2799_v33  ;;  %v8161_v49 = vadd.f32 %v6718_v40, %v6578_v55  ;;  %v2713_v51 = vpop.f32.mrb[11].mxu1 }
 0x30c   :  { %v8877_v53 = vpack.c.bf16 %v2799_v33, %v2796_v35  ;;  %v2898_v62 = vsub.f32 %v8160_v32, %v2796_v35  ;;  %v8162_v1 = vadd.f32 %v2713_v51, %v1784_v56 }
 0x30d   :  { %v2906_v5 = vand.u32 4294901760, %v2905_v44  ;;  %v2805_v10 = vand.u32 4294901760, %v8161_v49 }
 0x30e   :  { %v2899_v14 = vand.u32 4294901760, %v2898_v62  ;;  %v2802_v16 = vand.u32 4294901760, %v8162_v1  ;;  %v6721_v23 = vpop.f32.mrb[12].mxu1  ;;  %7500 = vmatprep.subr.bf16.mxu0 %v8877_v53  ;;  %v8880_v26 = vpack.c.bf16 %v2905_v44, %v2898_v62 }
 0x30f   :  { %v2919_v37 = vsub.f32 %v8161_v49, %v2805_v10  ;;  %v8163_v39 = vadd.f32 %v6721_v23, %v6581_v59  ;;  %v2725_v45 = vpop.f32.mrb[13].mxu1  ;;  %7502 = vmatpush3.bf16.msra.mxu0 %v8877_v53  ;;  %v2907_v52 = vsub.f32 %v2905_v44, %v2906_v5 }
 0x310   :  { %v8887_v54 = vpack.c.bf16 %v2805_v10, %v2802_v16  ;;  %v2912_v2 = vsub.f32 %v8162_v1, %v2802_v16  ;;  %v8164_v15 = vadd.f32 %v2725_v45, %v1804_v60  ;;  %v2900_v19 = vsub.f32 %v2898_v62, %v2899_v14 }
 0x311   :  { %v2920_v28 = vand.u32 4294901760, %v2919_v37  ;;  %v2811_v42 = vand.u32 4294901760, %v8163_v39  ;;  %v2908_v46 = vand.u32 4294901760, %v2907_v52  ;;  %v8889_v48 = vpack.c.bf16 %v2906_v5, %v2899_v14 }
 0x312   :  { %v2913_v57 = vand.u32 4294901760, %v2912_v2  ;;  %v2808_v6 = vand.u32 4294901760, %v8164_v15  ;;  %v6724_v0 = vpop.f32.mrb[14].mxu1  ;;  %7504 = vmatprep.subr.bf16.mxu0 %v8887_v54  ;;  %v2901_v8 = vand.u32 4294901760, %v2900_v19  ;;  %v8892_v9 = vpack.c.bf16 %v2919_v37, %v2912_v2 }
 0x313   :  { %v2933_v30 = vsub.f32 %v8163_v39, %v2811_v42  ;;  %v8165_v34 = vadd.f32 %v6724_v0, %v6584_v61  ;;  %v2737_v36 = vpop.f32.mrb[15].mxu1  ;;  %7506 = vmatpush3.bf16.msra.mxu0 %v8887_v54  ;;  %v2921_v47 = vsub.f32 %v2919_v37, %v2920_v28 }
 0x314   :  { %v8896_v43 = vpack.c.bf16 %v2811_v42, %v2808_v6  ;;  %v2926_v50 = vsub.f32 %v8164_v15, %v2808_v6  ;;  %v8166_v55 = vadd.f32 %v2737_v36, %v1824_v3  ;;  %v8898_v56 = vpack.c.bf16 %v2908_v46, %v2901_v8 }
 0x315   :  { %v2934_v59 = vand.u32 4294901760, %v2933_v30  ;;  %v2817_v60 = vand.u32 4294901760, %v8165_v34  ;;  %v2914_v24 = vsub.f32 %v2912_v2, %v2913_v57  ;;  %v2922_v25 = vand.u32 4294901760, %v2921_v47 }
 0x316   :  { %v2927_v27 = vand.u32 4294901760, %v2926_v50  ;;  %v2814_v32 = vand.u32 4294901760, %v8166_v55  ;;  %v6727_v33 = vpop.f32.mrb[16].mxu1  ;;  %7508 = vmatprep.subr.bf16.mxu0 %v8896_v43  ;;  %v8901_v61 = vpack.c.bf16 %v2933_v30, %v2926_v50  ;;  %v8903_v35 = vpack.c.bf16 %v2920_v28, %v2913_v57 }
 0x317   :  { %v2947_v40 = vsub.f32 %v8165_v34, %v2817_v60  ;;  %v8167_v44 = vadd.f32 %v6727_v33, %v8858_v4  ;;  %v2749_v49 = vpop.f32.mrb[17].mxu1  ;;  %7510 = vmatpush3.bf16.msra.mxu0 %v8896_v43  ;;  %v2915_v3 = vand.u32 4294901760, %v2914_v24  ;;  %v2935_v51 = vsub.f32 %v2933_v30, %v2934_v59 }
 0x318   :  { %v8907_v62 = vpack.c.bf16 %v2817_v60, %v2814_v32  ;;  %v2940_v1 = vsub.f32 %v8166_v55, %v2814_v32  ;;  %v8168_v5 = vadd.f32 %v2749_v49, %v8860_v7  ;;  %v2928_v10 = vsub.f32 %v2926_v50, %v2927_v27 }
 0x319   :  { %v2948_v14 = vand.u32 4294901760, %v2947_v40  ;;  %v2823_v16 = vand.u32 4294901760, %v8167_v44  ;;  %v8910_v23 = vpack.c.bf16 %v2922_v25, %v2915_v3  ;;  %v2936_v37 = vand.u32 4294901760, %v2935_v51 }
 0x31a   :  { %v2941_v39 = vand.u32 4294901760, %v2940_v1  ;;  %v2820_v45 = vand.u32 4294901760, %v8168_v5  ;;  %v6730_v52 = vpop.f32.mrb[18].mxu1  ;;  %7512 = vmatprep.subr.bf16.mxu0 %v8907_v62  ;;  %v2929_v4 = vand.u32 4294901760, %v2928_v10  ;;  %v8913_v2 = vpack.c.bf16 %v2947_v40, %v2940_v1 }
 0x31b   :  { %v2961_v15 = vsub.f32 %v8167_v44, %v2823_v16  ;;  %v8169_v19 = vadd.f32 %v6730_v52, %v8862_v11  ;;  %v2761_v28 = vpop.f32.mrb[19].mxu1  ;;  %7514 = vmatpush3.bf16.msra.mxu0 %v8907_v62  ;;  %v2949_v7 = vsub.f32 %v2947_v40, %v2948_v14  ;;  %v8917_v42 = vpack.c.bf16 %v2934_v59, %v2927_v27 }
 0x31c   :  { %v8919_v46 = vpack.c.bf16 %v2823_v16, %v2820_v45  ;;  %v2954_v57 = vsub.f32 %v8168_v5, %v2820_v45  ;;  %v8170_v6 = vadd.f32 %v2761_v28, %v8864_v12  ;;  %v8922_v0 = vpack.c.bf16 %v2936_v37, %v2929_v4 }
 0x31d   :  { %v2962_v8 = vand.u32 4294901760, %v2961_v15  ;;  %v2829_v30 = vand.u32 4294901760, %v8169_v19  ;;  %v2942_v34 = vsub.f32 %v2940_v1, %v2941_v39  ;;  %v2950_v36 = vand.u32 4294901760, %v2949_v7 }
 0x31e   :  { %v2955_v47 = vand.u32 4294901760, %v2954_v57  ;;  %v2826_v50 = vand.u32 4294901760, %v8170_v6  ;;  %v6733_v11 = vpop.f32.mrb[20].mxu1  ;;  %7516 = vmatprep.subr.bf16.mxu0 %v8919_v46  ;;  %v8925_v55 = vpack.c.bf16 %v2961_v15, %v2954_v57  ;;  %v8927_v59 = vpack.c.bf16 %v2948_v14, %v2941_v39 }
 0x31f   :  { %v2975_v60 = vsub.f32 %v8169_v19, %v2829_v30  ;;  %v8171_v24 = vadd.f32 %v6733_v11, %v8866_v13  ;;  %v2773_v25 = vpop.f32.mrb[21].mxu1  ;;  %7518 = vmatpush3.bf16.msra.mxu0 %v8919_v46  ;;  %v2943_v12 = vand.u32 4294901760, %v2942_v34  ;;  %v2963_v27 = vsub.f32 %v2961_v15, %v2962_v8 }
 0x320   :  { %v8931_v32 = vpack.c.bf16 %v2829_v30, %v2826_v50  ;;  %v2968_v33 = vsub.f32 %v8170_v6, %v2826_v50  ;;  %v8172_v40 = vadd.f32 %v2773_v25, %v8868_v17  ;;  %v2956_v44 = vsub.f32 %v2954_v57, %v2955_v47 }
 0x321   :  { %v2976_v49 = vand.u32 4294901760, %v2975_v60  ;;  %v2835_v3 = vand.u32 4294901760, %v8171_v24  ;;  %v7543_v51 = vpack.c.bf16 %v2950_v36, %v2943_v12  ;;  %v2964_v1 = vand.u32 4294901760, %v2963_v27 }
 0x322   :  { %v2969_v5 = vand.u32 4294901760, %v2968_v33  ;;  %v2832_v10 = vand.u32 4294901760, %v8172_v40  ;;  %v6736_v14 = vpop.f32.mrb[22].mxu1  ;;  %7520 = vmatprep.subr.bf16.mxu0 %v8931_v32  ;;  %v2957_v13 = vand.u32 4294901760, %v2956_v44  ;;  %v8935_v16 = vpack.c.bf16 %v2975_v60, %v2968_v33 }
 0x323   :  { %v2989_v37 = vsub.f32 %v8171_v24, %v2835_v3  ;;  %v8173_v39 = vadd.f32 %v6736_v14, %v8870_v18  ;;  %v2785_v45 = vpop.f32.mrb[23].mxu1  ;;  %7522 = vmatpush3.bf16.msra.mxu0 %v8931_v32  ;;  %v2977_v17 = vsub.f32 %v2975_v60, %v2976_v49  ;;  %v8939_v52 = vpack.c.bf16 %v2962_v8, %v2955_v47 }
 0x324   :  { %v8941_v4 = vpack.c.bf16 %v2835_v3, %v2832_v10  ;;  %v2982_v15 = vsub.f32 %v8172_v40, %v2832_v10  ;;  %v8174_v19 = vadd.f32 %v2785_v45, %v8872_v20  ;;  %v7547_v28 = vpack.c.bf16 %v2964_v1, %v2957_v13 }
 0x325   :  { %v2990_v7 = vand.u32 4294901760, %v2989_v37  ;;  %v2841_v57 = vand.u32 4294901760, %v8173_v39  ;;  %v2970_v6 = vsub.f32 %v2968_v33, %v2969_v5  ;;  %v2978_v30 = vand.u32 4294901760, %v2977_v17  ;;  %v4216_v17 = vld [vmem:[%s9907_s7 + $0x48] sm:$0xff] }
 0x326   :  { %v2983_v34 = vand.u32 4294901760, %v2982_v15  ;;  %v2838_v36 = vand.u32 4294901760, %v8174_v19  ;;  %7524 = vmatprep.subr.bf16.mxu0 %v8941_v4  ;;  %v7587_v18 = vpack.c.bf16 %v2989_v37, %v2982_v15  ;;  %v8945_v50 = vpack.c.bf16 %v2976_v49, %v2969_v5 }
 0x327   :  { %v2889_v8 = vsub.f32 %v8884_v29, %v2888_v21  ;;  %v3003_v47 = vsub.f32 %v8173_v39, %v2841_v57  ;;  %7526 = vmatpush3.bf16.msra.mxu0 %v8941_v4  ;;  %v2971_v20 = vand.u32 4294901760, %v2970_v6  ;;  %v2991_v11 = vsub.f32 %v2989_v37, %v2990_v7 }
 0x328   :  { %v8951_v60 = vpack.c.bf16 %v2841_v57, %v2838_v36  ;;  %v2996_v24 = vsub.f32 %v8174_v19, %v2838_v36  ;;  %v2984_v25 = vsub.f32 %v2982_v15, %v2983_v34  ;;  %v8953_v12 = vpack.c.bf16 %v2990_v7, %v2983_v34  ;;  %v9093_v15 = vld [vmem:[%s9907_s7 + $0x50] sm:$0xff]  ;;  %v9098_v19 = vld [vmem:[%s9907_s7 + $0x58] sm:$0xff]  ;;  %v9105_v7 = vld [vmem:[%s9907_s7 + $0x60] sm:$0xff] }
 0x329   :  { %v3004_v27 = vand.u32 4294901760, %v3003_v47  ;;  %v7551_v33 = vpack.c.bf16 %v2978_v30, %v2971_v20  ;;  %v2992_v40 = vand.u32 4294901760, %v2991_v11  ;;  %v2890_v5 = vand.u32 4294901760, %v2889_v8  ;;  %v9110_v57 = vld [vmem:[%s9907_s7 + $0x68] sm:$0xff] }
 0x32a   :  { %v2997_v44 = vand.u32 4294901760, %v2996_v24  ;;  %7528 = vmatprep.subr.bf16.mxu0 %v8951_v60  ;;  %v2985_v49 = vand.u32 4294901760, %v2984_v25  ;;  %v7591_v3 = vpack.c.bf16 %v3003_v47, %v2996_v24  ;;  %v4257_v36 = vand.u32 4294901760, %v9098_v19 }
 0x32b   :  { %7530 = vmatpush3.bf16.msra.mxu0 %v8951_v60  ;;  %v3005_v1 = vsub.f32 %v3003_v47, %v3004_v27  ;;  %v4263_v8 = vand.u32 4294901760, %v9110_v57 }
 0x32c   :  { %7532 = vmatprep.subr.bf16.mxu0 %v8898_v56  ;;  %v7555_v10 = vpack.c.bf16 %v2992_v40, %v2985_v49  ;;  %v2998_v14 = vsub.f32 %v2996_v24, %v2997_v44  ;;  %v8958_v13 = vpack.c.bf16 %v3004_v27, %v2997_v44  ;;  %v9139_v24 = vld [vmem:[%s9907_s7 + $0x78] sm:$0xff] }
 0x32d   :  { %v3006_v37 = vand.u32 4294901760, %v3005_v1  ;;  %v4269_v44 = vand.u32 4294901760, %v9139_v24 }
 0x32e   :  { %6770 = vmatmul.mubr.f32.vlgmr.msra.gmra.mrb[22].mxu0 %v2890_v5  ;;  %v2999_v39 = vand.u32 4294901760, %v2998_v14 }
 0x32f   :  { %7534 = vmatpush3.bf16.msra.mxu0 %v8898_v56  ;;  %6804 = vmatprep.mubr.f32.mxu0 %v8743_v58 }
 0x330   :  { %7536 = vmatprep.subr.bf16.mxu0 %v8910_v23  ;;  %v7559_v45 = vpack.c.bf16 %v3006_v37, %v2999_v39 }
 0x333   :  { %7538 = vmatpush3.bf16.msra.mxu0 %v8910_v23 }
 0x334   :  { %7540 = vmatprep.subr.bf16.mxu0 %v8922_v0 }
 0x337   :  { %7542 = vmatpush3.bf16.msra.mxu0 %v8922_v0  ;;  %v4213_v0 = vld [vmem:[%s9907_s7 + $0x30] sm:$0xff] }
 0x338   :  { %7544 = vmatprep.subr.bf16.mxu0 %v7543_v51 }
 0x33b   :  { %7546 = vmatpush3.bf16.msra.mxu0 %v7543_v51 }
 0x33c   :  { %7548 = vmatprep.subr.bf16.mxu0 %v7547_v28 }
 0x33f   :  { %7550 = vmatpush3.bf16.msra.mxu0 %v7547_v28  ;;  %v1609_v28 = vmax.f32 %v8590_v38, 0.0  ;;  %v4254_v38 = vand.u32 4294901760, %v9093_v15 }
 0x340   :  { %7552 = vmatprep.subr.bf16.mxu0 %v7551_v33 }
 0x341   :  { %v9129_v11 = vpack.c.bf16 %v4257_v36, %v4254_v38 }
 0x343   :  { %7554 = vmatpush3.bf16.msra.mxu0 %v7551_v33 }
 0x344   :  { %7556 = vmatprep.subr.bf16.mxu0 %v7555_v10 }
 0x347   :  { %7558 = vmatpush3.bf16.msra.mxu0 %v7555_v10 }
 0x348   :  { %7560 = vmatprep.subr.bf16.mxu0 %v7559_v45 }
 0x34b   :  { %7562 = vmatpush3.bf16.msra.mxu0 %v7559_v45 }
 0x34c   :  { %7564 = vmatprep.subr.bf16.mxu0 %v8880_v26 }
 0x34e   :  { %6805 = vmatmul.mubr.f32.vlgmr.msra.gmra.mrb[22].mxu0 %v8875_v41 }
 0x34f   :  { %7566 = vmatpush3.bf16.msra.mxu0 %v8880_v26  ;;  %6839 = vmatprep.mubr.f32.mxu0 %v8758_v22  ;;  %v1605_v22 = vmax.f32 %v8588_v31, 0.0  ;;  %v4208_v31 = vld [vmem:[%s9907_s7 + $0x8] sm:$0xff] }
 0x350   :  { %7568 = vmatprep.subr.bf16.mxu0 %v8892_v9 }
 0x353   :  { %7570 = vmatpush3.bf16.msra.mxu0 %v8892_v9  ;;  %v4210_v9 = vld [vmem:[%s9907_s7 + $0x18] sm:$0xff] }
 0x354   :  { %7572 = vmatprep.subr.bf16.mxu0 %v8901_v61  ;;  %v4233_v56 = vand.u32 4294901760, %v4210_v9 }
 0x357   :  { %7574 = vmatpush3.bf16.msra.mxu0 %v8901_v61 }
 0x358   :  { %7576 = vmatprep.subr.bf16.mxu0 %v8913_v2 }
 0x35b   :  { %7578 = vmatpush3.bf16.msra.mxu0 %v8913_v2 }
 0x35c   :  { %7580 = vmatprep.subr.bf16.mxu0 %v8925_v55 }
 0x35f   :  { %7582 = vmatpush3.bf16.msra.mxu0 %v8925_v55  ;;  %v4214_v55 = vld [vmem:[%s9907_s7 + $0x38] sm:$0xff] }
 0x360   :  { %7584 = vmatprep.subr.bf16.mxu0 %v8935_v16  ;;  %v4245_v51 = vand.u32 4294901760, %v4214_v55 }
 0x362   :  { %v9172_v37 = vsub.f32 %v4214_v55, %v4245_v51 }
 0x363   :  { %7586 = vmatpush3.bf16.msra.mxu0 %v8935_v16  ;;  %v4215_v16 = vld [vmem:[%s9907_s7 + $0x40] sm:$0xff] }
 0x364   :  { %7588 = vmatprep.subr.bf16.mxu0 %v7587_v18 }
 0x367   :  { %7590 = vmatpush3.bf16.msra.mxu0 %v7587_v18  ;;  %v9121_v18 = vand.u32 4294901760, %v1609_v28 }
 0x368   :  { %7592 = vmatprep.subr.bf16.mxu0 %v7591_v3 }
 0x369   :  { %v9146_v27 = vsub.f32 %v1609_v28, %v9121_v18 }
 0x36b   :  { %7594 = vmatpush3.bf16.msra.mxu0 %v7591_v3  ;;  %v9925_v39 = vand.u32 4294901760, %v9146_v27 }
 0x36c   :  { %7596 = vmatprep.subr.bf16.mxu0 %v8877_v53 }
 0x36e   :  { %6840 = vmatmul.mubr.f32.vlgmr.msra.gmra.mrb[22].mxu0 %v8884_v29  ;;  %v4227_v29 = vand.u32 4294901760, %v4208_v31 }
 0x36f   :  { %7598 = vmatpush3.bf16.msra.mxu0 %v8877_v53  ;;  %6874 = vmatprep.mubr.f32.mxu0 %v2878_v63  ;;  %v9030_v63 = vand.u32 4294901760, %v1605_v22 }
 0x370   :  { %7600 = vmatprep.subr.bf16.mxu0 %v8887_v54  ;;  %v9114_v30 = vsub.f32 %v4208_v31, %v4227_v29 }
 0x372   :  { %v9928_v20 = vand.u32 4294901760, %v9114_v30 }
 0x373   :  { %7602 = vmatpush3.bf16.msra.mxu0 %v8887_v54 }
 0x374   :  { %7604 = vmatprep.subr.bf16.mxu0 %v8896_v43  ;;  %v4335_v3 = vsub.f32 %v9114_v30, %v9928_v20  ;;  %v9416_v20 = vld [vmem:[%s9906_s6 + $0x68] sm:$0xff] }
 0x377   :  { %7606 = vmatpush3.bf16.msra.mxu0 %v8896_v43 }
 0x378   :  { %7608 = vmatprep.subr.bf16.mxu0 %v8907_v62 }
 0x37b   :  { %7610 = vmatpush3.bf16.msra.mxu0 %v8907_v62 }
 0x37c   :  { %7612 = vmatprep.subr.bf16.mxu0 %v8919_v46 }
 0x37f   :  { %7614 = vmatpush3.bf16.msra.mxu0 %v8919_v46 }
 0x380   :  { %7616 = vmatprep.subr.bf16.mxu0 %v8931_v32 }
 0x383   :  { %7618 = vmatpush3.bf16.msra.mxu0 %v8931_v32 }
 0x384   :  { %7620 = vmatprep.subr.bf16.mxu0 %v8941_v4 }
 0x387   :  { %7622 = vmatpush3.bf16.msra.mxu0 %v8941_v4 }
 0x388   :  { %7624 = vmatprep.subr.bf16.mxu0 %v8951_v60 }
 0x38b   :  { %7626 = vmatpush3.bf16.msra.mxu0 %v8951_v60 }
 0x38c   :  { %7628 = vmatprep.subr.bf16.mxu0 %v8889_v48 }
 0x38e   :  { %6875 = vmatmul.mubr.f32.vlgmr.msra.gmra.mrb[22].mxu0 %v2888_v21 }
 0x38f   :  { %7630 = vmatpush3.bf16.msra.mxu0 %v8889_v48  ;;  %6909 = vmatprep.mubr.f32.mxu0 %v8743_v58  ;;  %v4209_v48 = vld [vmem:[%s9907_s7 + $0x10] sm:$0xff] }
 0x390   :  { %7632 = vmatprep.subr.bf16.mxu0 %v8903_v35 }
 0x393   :  { %7634 = vmatpush3.bf16.msra.mxu0 %v8903_v35  ;;  %v4211_v35 = vld [vmem:[%s9907_s7 + $0x20] sm:$0xff] }
 0x394   :  { %7636 = vmatprep.subr.bf16.mxu0 %v8917_v42  ;;  %v4236_v2 = vand.u32 4294901760, %v4211_v35 }
 0x396   :  { %v9166_v10 = vsub.f32 %v4211_v35, %v4236_v2 }
 0x397   :  { %7638 = vmatpush3.bf16.msra.mxu0 %v8917_v42 }
 0x398   :  { %7640 = vmatprep.subr.bf16.mxu0 %v8927_v59 }
 0x39b   :  { %7642 = vmatpush3.bf16.msra.mxu0 %v8927_v59 }
 0x39c   :  { %7644 = vmatprep.subr.bf16.mxu0 %v8939_v52 }
 0x39f   :  { %7646 = vmatpush3.bf16.msra.mxu0 %v8939_v52  ;;  %v4248_v52 = vand.u32 4294901760, %v4215_v16 }
 0x3a0   :  { %7648 = vmatprep.subr.bf16.mxu0 %v8945_v50 }
 0x3a1   :  { %v9197_v35 = vsub.f32 %v4215_v16, %v4248_v52 }
 0x3a3   :  { %7650 = vmatpush3.bf16.msra.mxu0 %v8945_v50  ;;  %v4260_v50 = vand.u32 4294901760, %v9105_v7 }
 0x3a4   :  { %7652 = vmatprep.subr.bf16.mxu0 %v8953_v12 }
 0x3a5   :  { %v9152_v33 = vpack.c.bf16 %v4263_v8, %v4260_v50 }
 0x3a7   :  { %7654 = vmatpush3.bf16.msra.mxu0 %v8953_v12  ;;  %v9143_v12 = vsub.f32 %v4210_v9, %v4233_v56 }
 0x3a8   :  { %7656 = vmatprep.subr.bf16.mxu0 %v8958_v13 }
 0x3a9   :  { %v9926_v5 = vand.u32 4294901760, %v9143_v12 }
 0x3ab   :  { %7658 = vmatpush3.bf16.msra.mxu0 %v8958_v13 }
 0x3ac   :  { %7660 = vmatprep.subr.bf16.mxu0 %v8877_v53 }
 0x3ae   :  { %6910 = vmatmul.mubr.f32.vlgmr.msra.gmra.mrb[22].mxu0 %v8875_v41 }
 0x3af   :  { %7662 = vmatpush3.bf16.msra.mxu0 %v8877_v53  ;;  %6944 = vmatprep.mubr.f32.mxu0 %v8743_v58  ;;  %v9035_v58 = vsub.f32 %v1605_v22, %v9030_v63  ;;  %v4207_v53 = vld [vmem:[%s9907_s7] sm:$0xff] }
 0x3b0   :  { %7664 = vmatprep.subr.bf16.mxu0 %v8887_v54  ;;  %v4224_v26 = vand.u32 4294901760, %v4207_v53 }
 0x3b2   :  { %v9054_v21 = vpack.c.bf16 %v4227_v29, %v4224_v26  ;;  %v9112_v6 = vsub.f32 %v4207_v53, %v4224_v26  ;;  %v4336_v53 = vand.u32 4294901760, %v4335_v3  ;;  %v4349_v26 = vsub.f32 %v9143_v12, %v9926_v5 }
 0x3b3   :  { %7666 = vmatpush3.bf16.msra.mxu0 %v8887_v54  ;;  %v9938_v54 = vand.u32 4294901760, %v9035_v58  ;;  %v9924_v29 = vand.u32 4294901760, %v9166_v10 }
 0x3b4   :  { %7668 = vmatprep.subr.bf16.mxu0 %v8896_v43  ;;  %v9929_v47 = vand.u32 4294901760, %v9112_v6 }
 0x3b5   :  { %v4307_v61 = vsub.f32 %v9035_v58, %v9938_v54 }
 0x3b6   :  { %v4328_v49 = vsub.f32 %v9112_v6, %v9929_v47 }
 0x3b7   :  { %7670 = vmatpush3.bf16.msra.mxu0 %v8896_v43  ;;  %v4230_v43 = vand.u32 4294901760, %v4209_v48 }
 0x3b8   :  { %7672 = vmatprep.subr.bf16.mxu0 %v8907_v62  ;;  %v4329_v22 = vand.u32 4294901760, %v4328_v49 }
 0x3b9   :  { %v9067_v23 = vpack.c.bf16 %v4233_v56, %v4230_v43  ;;  %v9141_v25 = vsub.f32 %v4209_v48, %v4230_v43  ;;  %v9921_v43 = vand.u32 4294901760, %v9172_v37  ;;  %v4317_v56 = vsub.f32 %v9146_v27, %v9925_v39 }
 0x3bb   :  { %7674 = vmatpush3.bf16.msra.mxu0 %v8907_v62  ;;  %v4212_v62 = vld [vmem:[%s9907_s7 + $0x28] sm:$0xff]  ;;  %v9927_v1 = vand.u32 4294901760, %v9141_v25 }
 0x3bc   :  { %7676 = vmatprep.subr.bf16.mxu0 %v8919_v46  ;;  %v4239_v42 = vand.u32 4294901760, %v4212_v62 }
 0x3bd   :  { %v4342_v31 = vsub.f32 %v9141_v25, %v9927_v1  ;;  %v9411_v1 = vld [vmem:[%s9906_s6 + $0x60] sm:$0xff] }
 0x3be   :  { %v9078_v59 = vpack.c.bf16 %v4239_v42, %v4236_v2  ;;  %v9168_v14 = vsub.f32 %v4212_v62, %v4239_v42  ;;  %v4350_v42 = vand.u32 4294901760, %v4349_v26  ;;  %v9235_v26 = vsub.f32 %v9105_v7, %v4260_v50 }
 0x3bf   :  { %7678 = vmatpush3.bf16.msra.mxu0 %v8919_v46  ;;  %v4308_v46 = vand.u32 4294901760, %v4307_v61  ;;  %v7915_v61 = vpack.c.bf16 %v4336_v53, %v4329_v22  ;;  %v4343_v2 = vand.u32 4294901760, %v4342_v31 }
 0x3c0   :  { %7680 = vmatprep.subr.bf16.mxu0 %v8931_v32  ;;  %v9923_v48 = vand.u32 4294901760, %v9168_v14  ;;  %v9916_v7 = vand.u32 4294901760, %v9235_v26 }
 0x3c1   :  { %v7919_v28 = vpack.c.bf16 %v4350_v42, %v4343_v2 }
 0x3c3   :  { %7682 = vmatpush3.bf16.msra.mxu0 %v8931_v32  ;;  %v4242_v32 = vand.u32 4294901760, %v4213_v0 }
 0x3c4   :  { %7684 = vmatprep.subr.bf16.mxu0 %v8941_v4 }
 0x3c5   :  { %v9170_v13 = vsub.f32 %v4213_v0, %v4242_v32  ;;  %v4363_v0 = vsub.f32 %v9168_v14, %v9923_v48 }
 0x3c7   :  { %7686 = vmatpush3.bf16.msra.mxu0 %v8941_v4  ;;  %v4251_v4 = vand.u32 4294901760, %v4216_v17  ;;  %v9922_v9 = vand.u32 4294901760, %v9170_v13  ;;  %v4364_v3 = vand.u32 4294901760, %v4363_v0 }
 0x3c8   :  { %7688 = vmatprep.subr.bf16.mxu0 %v8951_v60 }
 0x3c9   :  { %v9117_v34 = vpack.c.bf16 %v4251_v4, %v4248_v52  ;;  %v9199_v62 = vsub.f32 %v4216_v17, %v4251_v4  ;;  %v4370_v55 = vsub.f32 %v9170_v13, %v9922_v9  ;;  %v9218_v17 = vsub.f32 %v9093_v15, %v4254_v38 }
 0x3ca   :  { %v9221_v52 = vsub.f32 %v9098_v19, %v4257_v36  ;;  %v4318_v4 = vand.u32 4294901760, %v4317_v56  ;;  %v9240_v56 = vsub.f32 %v9110_v57, %v4263_v8  ;;  %v9258_v8 = vsub.f32 %v9139_v24, %v4269_v44 }
 0x3cb   :  { %7690 = vmatpush3.bf16.msra.mxu0 %v8951_v60  ;;  %v9134_v60 = vld [vmem:[%s9907_s7 + $0x70] sm:$0xff]  ;;  %v9919_v16 = vand.u32 4294901760, %v9199_v62  ;;  %v4371_v22 = vand.u32 4294901760, %v4370_v55  ;;  %v9918_v19 = vand.u32 4294901760, %v9218_v17 }
 0x3cc   :  { %7884 = vmatprep.subr.bf16.mxu0 %v9054_v21  ;;  %v4266_v40 = vand.u32 4294901760, %v9134_v60  ;;  %v9917_v38 = vand.u32 4294901760, %v9221_v52  ;;  %v9915_v50 = vand.u32 4294901760, %v9240_v56  ;;  %v7967_v48 = vpack.c.bf16 %v9221_v52, %v9218_v17 }
 0x3cd   :  { %v4391_v15 = vsub.f32 %v9199_v62, %v9919_v16 }
 0x3ce   :  { %6945 = vmatmul.mubr.f32.vlgmr.msra.gmra.mrb[22].mxu0 %v8875_v41  ;;  %v9088_v41 = vpack.c.bf16 %v4245_v51, %v4242_v32  ;;  %v9180_v45 = vpack.c.bf16 %v4269_v44, %v4266_v40  ;;  %v4377_v32 = vsub.f32 %v9172_v37, %v9921_v43  ;;  %v9920_v51 = vand.u32 4294901760, %v9197_v35 }
 0x3cf   :  { %7886 = vmatpush3.bf16.msra.mxu0 %v9054_v21  ;;  %7189 = vmatprep.mubr.f32.mxu0 %v4308_v46  ;;  %v4356_v46 = vsub.f32 %v9166_v10, %v9924_v29  ;;  %v4392_v42 = vand.u32 4294901760, %v4391_v15  ;;  %v4405_v0 = vsub.f32 %v9221_v52, %v9917_v38  ;;  %v9253_v57 = vsub.f32 %v9134_v60, %v4266_v40  ;;  %v9359_v38 = vld [vmem:[%s9906_s6 + $0x48] sm:$0xff]  ;;  %v9395_v29 = vld [vmem:[%s9906_s6 + $0x58] sm:$0xff] }
 0x3d0   :  { %7888 = vmatprep.subr.bf16.mxu0 %v9067_v23  ;;  %v4378_v53 = vand.u32 4294901760, %v4377_v32  ;;  %v4384_v31 = vsub.f32 %v9197_v35, %v9920_v51  ;;  %v9913_v40 = vand.u32 4294901760, %v9258_v8  ;;  %v9932_v51 = vand.u32 4294901760, %v9359_v38 }
 0x3d1   :  { %v4357_v49 = vand.u32 4294901760, %v4356_v46  ;;  %v4398_v46 = vsub.f32 %v9218_v17, %v9918_v19  ;;  %v9914_v60 = vand.u32 4294901760, %v9253_v57  ;;  %v7959_v19 = vpack.c.bf16 %v9172_v37, %v9170_v13 }
 0x3d2   :  { %v4385_v2 = vand.u32 4294901760, %v4384_v31  ;;  %v7963_v43 = vpack.c.bf16 %v9199_v62, %v9197_v35  ;;  %v9930_v5 = vand.u32 4294901760, %v9395_v29  ;;  %v7975_v47 = vpack.c.bf16 %v9258_v8, %v9253_v57 }
 0x3d3   :  { %7890 = vmatpush3.bf16.msra.mxu0 %v9067_v23  ;;  %v7923_v36 = vpack.c.bf16 %v4364_v3, %v4357_v49  ;;  %v4399_v32 = vand.u32 4294901760, %v4398_v46  ;;  %v4419_v49 = vsub.f32 %v9240_v56, %v9915_v50  ;;  %v9284_v46 = vld [vmem:[%s9906_s6 + $0x8] sm:$0xff] }
 0x3d4   :  { %7892 = vmatprep.subr.bf16.mxu0 %v9078_v59  ;;  %v7931_v55 = vpack.c.bf16 %v4392_v42, %v4385_v2  ;;  %v7947_v2 = vpack.c.bf16 %v9114_v30, %v9112_v6  ;;  %v9279_v42 = vld [vmem:[%s9906_s6] sm:$0xff] }
 0x3d5   :  { %v4420_v3 = vand.u32 4294901760, %v4419_v49  ;;  %v9305_v49 = vld [vmem:[%s9906_s6 + $0x18] sm:$0xff] }
 0x3d7   :  { %7894 = vmatpush3.bf16.msra.mxu0 %v9078_v59 }
 0x3d8   :  { %7896 = vmatprep.subr.bf16.mxu0 %v9088_v41 }
 0x3db   :  { %7898 = vmatpush3.bf16.msra.mxu0 %v9088_v41 }
 0x3dc   :  { %7900 = vmatprep.subr.bf16.mxu0 %v9117_v34 }
 0x3df   :  { %7902 = vmatpush3.bf16.msra.mxu0 %v9117_v34 }
 0x3e0   :  { %7904 = vmatprep.subr.bf16.mxu0 %v9129_v11 }
 0x3e3   :  { %7906 = vmatpush3.bf16.msra.mxu0 %v9129_v11 }
 0x3e4   :  { %7908 = vmatprep.subr.bf16.mxu0 %v9152_v33 }
 0x3e7   :  { %7910 = vmatpush3.bf16.msra.mxu0 %v9152_v33 }
 0x3e8   :  { %7912 = vmatprep.subr.bf16.mxu0 %v9180_v45 }
 0x3eb   :  { %7914 = vmatpush3.bf16.msra.mxu0 %v9180_v45 }
 0x3ec   :  { %7916 = vmatprep.subr.bf16.mxu0 %v7915_v61 }
 0x3ee   :  { %7190 = vmatmul.mubr.f32.vlgmr.msra.gmra.mrb[24].mxu0 %v4318_v4  ;;  %v4406_v4 = vand.u32 4294901760, %v4405_v0  ;;  %v7951_v0 = vpack.c.bf16 %v9143_v12, %v9141_v25 }
 0x3ef   :  { %7918 = vmatpush3.bf16.msra.mxu0 %v7915_v61  ;;  %7224 = vmatprep.mubr.f32.mxu0 %v9030_v63  ;;  %v7927_v61 = vpack.c.bf16 %v4378_v53, %v4371_v22  ;;  %v4426_v22 = vsub.f32 %v9253_v57, %v9914_v60  ;;  %v4433_v53 = vsub.f32 %v9258_v8, %v9913_v40 }
 0x3f0   :  { %7920 = vmatprep.subr.bf16.mxu0 %v7919_v28  ;;  %v7935_v24 = vpack.c.bf16 %v4406_v4, %v4399_v32  ;;  %v3524_v32 = vand.u32 4294901760, %v9284_v46 }
 0x3f1   :  { %v4427_v15 = vand.u32 4294901760, %v4426_v22  ;;  %v9318_v22 = vld [vmem:[%s9906_s6 + $0x28] sm:$0xff] }
 0x3f3   :  { %7922 = vmatpush3.bf16.msra.mxu0 %v7919_v28  ;;  %v4412_v28 = vsub.f32 %v9235_v26, %v9916_v7  ;;  %v9354_v7 = vld [vmem:[%s9906_s6 + $0x40] sm:$0xff] }
 0x3f4   :  { %7924 = vmatprep.subr.bf16.mxu0 %v7923_v36  ;;  %v9933_v16 = vand.u32 4294901760, %v9354_v7 }
 0x3f5   :  { %v4413_v44 = vand.u32 4294901760, %v4412_v28  ;;  %v9300_v28 = vld [vmem:[%s9906_s6 + $0x10] sm:$0xff] }
 0x3f6   :  { %v9381_v9 = vpack.c.bf16 %v9932_v51, %v9933_v16  ;;  %v9438_v16 = vsub.f32 %v9284_v46, %v3524_v32 }
 0x3f7   :  { %7926 = vmatpush3.bf16.msra.mxu0 %v7923_v36  ;;  %v7939_v31 = vpack.c.bf16 %v4420_v3, %v4413_v44  ;;  %v4434_v36 = vand.u32 4294901760, %v4433_v53  ;;  %v3527_v44 = vand.u32 4294901760, %v9300_v28  ;;  %v3530_v3 = vand.u32 4294901760, %v9305_v49 }
 0x3f8   :  { %7928 = vmatprep.subr.bf16.mxu0 %v7927_v61  ;;  %9972 = vst [vmem:[#allocation9_spill] sm:$0xff] %v9381_v9 }
 0x3f9   :  { %v9471_v54 = vsub.f32 %v9300_v28, %v3527_v44 }
 0x3fb   :  { %7930 = vmatpush3.bf16.msra.mxu0 %v7927_v61  ;;  %v7943_v61 = vpack.c.bf16 %v4434_v36, %v4427_v15  ;;  %v9329_v15 = vld [vmem:[%s9906_s6 + $0x38] sm:$0xff]  ;;  %v7955_v36 = vpack.c.bf16 %v9168_v14, %v9166_v10 }
 0x3fc   :  { %7932 = vmatprep.subr.bf16.mxu0 %v7931_v55  ;;  %v9934_v50 = vand.u32 4294901760, %v9329_v15 }
 0x3ff   :  { %7934 = vmatpush3.bf16.msra.mxu0 %v7931_v55  ;;  %v3521_v55 = vand.u32 4294901760, %v9279_v42 }
 0x400   :  { %7936 = vmatprep.subr.bf16.mxu0 %v7935_v24 }
 0x401   :  { %v9295_v4 = vpack.c.bf16 %v3524_v32, %v3521_v55  ;;  %v9433_v51 = vsub.f32 %v9279_v42, %v3521_v55  ;;  %v9943_v32 = vand.u32 4294901760, %v9438_v16 }
 0x403   :  { %7938 = vmatpush3.bf16.msra.mxu0 %v7935_v24  ;;  %v9310_v24 = vld [vmem:[%s9906_s6 + $0x20] sm:$0xff]  ;;  %7692 = vmatprep.subr.bf16.mxu1 %v9295_v4  ;;  %v9940_v46 = vand.u32 4294901760, %v9433_v51 }
 0x404   :  { %7940 = vmatprep.subr.bf16.mxu0 %v7939_v31  ;;  %v3533_v53 = vand.u32 4294901760, %v9310_v24  ;;  %7694 = vmatpush3.bf16.msra.mxu1 %v9295_v4 }
 0x407   :  { %7942 = vmatpush3.bf16.msra.mxu0 %v7939_v31  ;;  %v9324_v31 = vld [vmem:[%s9906_s6 + $0x30] sm:$0xff] }
 0x408   :  { %7944 = vmatprep.subr.bf16.mxu0 %v7943_v61  ;;  %v9937_v60 = vand.u32 4294901760, %v9324_v31 }
 0x40b   :  { %7946 = vmatpush3.bf16.msra.mxu0 %v7943_v61  ;;  %v9939_v61 = vand.u32 4294901760, %v9318_v22 }
 0x40c   :  { %7948 = vmatprep.subr.bf16.mxu0 %v7947_v2 }
 0x40d   :  { %v9346_v40 = vpack.c.bf16 %v9939_v61, %v3533_v53  ;;  %v9476_v61 = vsub.f32 %v9305_v49, %v3530_v3  ;;  %v9492_v49 = vsub.f32 %v9310_v24, %v3533_v53 }
 0x40e   :  { %7225 = vmatmul.mubr.f32.vlgmr.msra.gmra.mrb[24].mxu0 %v9121_v18 }
 0x40f   :  { %7950 = vmatpush3.bf16.msra.mxu0 %v7947_v2  ;;  %7259 = vmatprep.mubr.f32.mxu0 %v9035_v58  ;;  %v9340_v2 = vpack.c.bf16 %v3530_v3, %v3527_v44  ;;  %9970 = vst [vmem:[#allocation7_spill] sm:$0xff] %v9346_v40  ;;  %v9977_v44 = vand.u32 4294901760, %v9035_v58  ;;  %v9945_v53 = vand.u32 4294901760, %v9492_v49 }
 0x410   :  { %7952 = vmatprep.subr.bf16.mxu0 %v7951_v0 }
 0x411   :  { %7696 = vmatprep.subr.bf16.mxu1 %v9340_v2 }
 0x412   :  { %7698 = vmatpush3.bf16.msra.mxu1 %v9340_v2 }
 0x413   :  { %7954 = vmatpush3.bf16.msra.mxu0 %v7951_v0  ;;  %7700 = vmatprep.subr.bf16.mxu1 %v9346_v40  ;;  %v9369_v0 = vpack.c.bf16 %v9934_v50, %v9937_v60  ;;  %v9443_v50 = vld [vmem:[%s9906_s6 + $0x70] sm:$0xff]  ;;  %v3632_v60 = vsub.f32 %v9438_v16, %v9943_v32  ;;  %v9944_v32 = vand.u32 4294901760, %v9476_v61 }
 0x414   :  { %7956 = vmatprep.subr.bf16.mxu0 %v7955_v36  ;;  %v9942_v42 = vand.u32 4294901760, %v9443_v50 }
 0x415   :  { %9971 = vst [vmem:[#allocation8_spill] sm:$0xff] %v9369_v0  ;;  %v3646_v3 = vsub.f32 %v9476_v61, %v9944_v32 }
 0x416   :  { %7702 = vmatpush3.bf16.msra.mxu1 %v9346_v40 }
 0x417   :  { %7958 = vmatpush3.bf16.msra.mxu0 %v7955_v36  ;;  %7704 = vmatprep.subr.bf16.mxu1 %v9369_v0  ;;  %v9390_v36 = vld [vmem:[%s9906_s6 + $0x50] sm:$0xff] }
 0x418   :  { %7960 = vmatprep.subr.bf16.mxu0 %v7959_v19  ;;  %v9931_v39 = vand.u32 4294901760, %v9390_v36 }
 0x41a   :  { %7706 = vmatpush3.bf16.msra.mxu1 %v9369_v0 }
 0x41b   :  { %7962 = vmatpush3.bf16.msra.mxu0 %v7959_v19  ;;  %7708 = vmatprep.subr.bf16.mxu1 %v9381_v9  ;;  %v7971_v19 = vpack.c.bf16 %v9240_v56, %v9235_v26 }
 0x41c   :  { %7964 = vmatprep.subr.bf16.mxu0 %v7963_v43 }
 0x41e   :  { %7710 = vmatpush3.bf16.msra.mxu1 %v9381_v9 }
 0x41f   :  { %7966 = vmatpush3.bf16.msra.mxu0 %v7963_v43  ;;  %v9406_v43 = vpack.c.bf16 %v9930_v5, %v9931_v39  ;;  %v9936_v5 = vand.u32 4294901760, %v9411_v1 }
 0x420   :  { %7968 = vmatprep.subr.bf16.mxu0 %v7967_v48 }
 0x421   :  { %9973 = vst [vmem:[#allocation10_spill] sm:$0xff] %v9406_v43  ;;  %7712 = vmatprep.subr.bf16.mxu1 %v9406_v43 }
 0x422   :  { %7714 = vmatpush3.bf16.msra.mxu1 %v9406_v43 }
 0x423   :  { %7970 = vmatpush3.bf16.msra.mxu0 %v7967_v48  ;;  %v9935_v48 = vand.u32 4294901760, %v9416_v20 }
 0x424   :  { %7972 = vmatprep.subr.bf16.mxu0 %v7971_v19 }
 0x425   :  { %v9428_v39 = vpack.c.bf16 %v9935_v48, %v9936_v5  ;;  %v9448_v48 = vld [vmem:[%s9906_s6 + $0x78] sm:$0xff]  ;;  %v3625_v5 = vsub.f32 %v9433_v51, %v9940_v46 }
 0x426   :  { %v9941_v55 = vand.u32 4294901760, %v9448_v48 }
 0x427   :  { %9974 = vst [vmem:[#allocation11_spill] sm:$0xff] %v9428_v39  ;;  %7974 = vmatpush3.bf16.msra.mxu0 %v7971_v19  ;;  %7716 = vmatprep.subr.bf16.mxu1 %v9428_v39  ;;  %v3626_v46 = vand.u32 4294901760, %v3625_v5  ;;  %v9976_v5 = vand.u32 4294901760, %v9318_v22 }
 0x428   :  { %7976 = vmatprep.subr.bf16.mxu0 %v7975_v47  ;;  %7718 = vmatpush3.bf16.msra.mxu1 %v9428_v39  ;;  %v9460_v19 = vpack.c.bf16 %v9941_v55, %v9942_v42  ;;  %v3633_v55 = vand.u32 4294901760, %v3632_v60  ;;  %v9946_v42 = vand.u32 4294901760, %v9471_v54 }
 0x429   :  { %v9497_v60 = vsub.f32 %v9318_v22, %v9976_v5  ;;  %v3647_v22 = vand.u32 4294901760, %v3646_v3  ;;  %v9978_v5 = vand.u32 4294901760, %v9324_v31 }
 0x42a   :  { %9975 = vst [vmem:[#allocation12_spill] sm:$0xff] %v9460_v19  ;;  %7720 = vmatprep.subr.bf16.mxu1 %v9460_v19  ;;  %v3639_v28 = vsub.f32 %v9471_v54, %v9946_v42 }
 0x42b   :  { %7978 = vmatpush3.bf16.msra.mxu0 %v7975_v47  ;;  %v9484_v47 = vpack.c.bf16 %v3633_v55, %v3626_v46  ;;  %v9947_v55 = vand.u32 4294901760, %v9497_v60  ;;  %v3653_v46 = vsub.f32 %v9492_v49, %v9945_v53 }
 0x42c   :  { %7980 = vmatprep.subr.bf16.mxu0 %v9054_v21  ;;  %7722 = vmatpush3.bf16.msra.mxu1 %v9460_v19  ;;  %v3640_v24 = vand.u32 4294901760, %v3639_v28  ;;  %v9979_v28 = vand.u32 4294901760, %v9329_v15 }
 0x42d   :  { %7724 = vmatprep.subr.bf16.mxu1 %v9484_v47  ;;  %v3660_v58 = vsub.f32 %v9497_v60, %v9947_v55  ;;  %v3654_v53 = vand.u32 4294901760, %v3653_v46  ;;  %v9981_v46 = vand.u32 4294901760, %v9359_v38 }
 0x42e   :  { %7260 = vmatmul.mubr.f32.vlgmr.msra.gmra.mrb[24].mxu0 %v9146_v27  ;;  %v9523_v32 = vsub.f32 %v9329_v15, %v9979_v28  ;;  %v9526_v3 = vpack.c.bf16 %v3647_v22, %v3640_v24  ;;  %v9980_v24 = vand.u32 4294901760, %v9354_v7 }
 0x42f   :  { %7982 = vmatpush3.bf16.msra.mxu0 %v9054_v21  ;;  %7294 = vmatprep.mubr.f32.mxu0 %v9977_v44  ;;  %v9518_v44 = vsub.f32 %v9324_v31, %v9978_v5  ;;  %v3661_v42 = vand.u32 4294901760, %v3660_v58 }
 0x430   :  { %7984 = vmatprep.subr.bf16.mxu0 %v9067_v23  ;;  %v9952_v19 = vand.u32 4294901760, %v9523_v32  ;;  %v9542_v22 = vsub.f32 %v9354_v7, %v9980_v24  ;;  %v9982_v24 = vand.u32 4294901760, %v9390_v36 }
 0x431   :  { %v9953_v55 = vand.u32 4294901760, %v9518_v44  ;;  %v9531_v39 = vpack.c.bf16 %v3661_v42, %v3654_v53  ;;  %v9548_v42 = vsub.f32 %v9359_v38, %v9981_v46  ;;  %v9983_v38 = vand.u32 4294901760, %v9395_v29 }
 0x432   :  { %v3674_v15 = vsub.f32 %v9523_v32, %v9952_v19  ;;  %v9955_v5 = vand.u32 4294901760, %v9542_v22 }
 0x433   :  { %7986 = vmatpush3.bf16.msra.mxu0 %v9067_v23  ;;  %v3667_v31 = vsub.f32 %v9518_v44, %v9953_v55  ;;  %v9954_v28 = vand.u32 4294901760, %v9548_v42  ;;  %v9561_v55 = vsub.f32 %v9390_v36, %v9982_v24 }
 0x434   :  { %7988 = vmatprep.subr.bf16.mxu0 %v9078_v59  ;;  %v3675_v58 = vand.u32 4294901760, %v3674_v15  ;;  %v3681_v7 = vsub.f32 %v9542_v22, %v9955_v5 }
 0x435   :  { %v3668_v53 = vand.u32 4294901760, %v3667_v31  ;;  %v9566_v31 = vsub.f32 %v9395_v29, %v9983_v38  ;;  %v3688_v15 = vsub.f32 %v9548_v42, %v9954_v28  ;;  %v9984_v38 = vand.u32 4294901760, %v9411_v1 }
 0x436   :  { %v3682_v46 = vand.u32 4294901760, %v3681_v7  ;;  %v9985_v7 = vand.u32 4294901760, %v9416_v20 }
 0x437   :  { %7990 = vmatpush3.bf16.msra.mxu0 %v9078_v59  ;;  %v9553_v19 = vpack.c.bf16 %v3675_v58, %v3668_v53  ;;  %v9956_v53 = vand.u32 4294901760, %v9561_v55  ;;  %v9959_v58 = vand.u32 4294901760, %v9566_v31  ;;  %v3689_v36 = vand.u32 4294901760, %v3688_v15 }
 0x438   :  { %7992 = vmatprep.subr.bf16.mxu0 %v9088_v41  ;;  %v9584_v28 = vsub.f32 %v9411_v1, %v9984_v38  ;;  %v9589_v5 = vsub.f32 %v9416_v20, %v9985_v7 }
 0x439   :  { %v3695_v24 = vsub.f32 %v9561_v55, %v9956_v53  ;;  %v3702_v29 = vsub.f32 %v9566_v31, %v9959_v58  ;;  %v9592_v15 = vpack.c.bf16 %v3689_v36, %v3682_v46  ;;  %v9986_v46 = vand.u32 4294901760, %v9443_v50 }
 0x43a   :  { %v9966_v58 = vand.u32 4294901760, %v9584_v28  ;;  %v9964_v9 = vand.u32 4294901760, %v9589_v5 }
 0x43b   :  { %7994 = vmatpush3.bf16.msra.mxu0 %v9088_v41  ;;  %v3696_v53 = vand.u32 4294901760, %v3695_v24  ;;  %v3703_v43 = vand.u32 4294901760, %v3702_v29  ;;  %v9608_v36 = vsub.f32 %v9443_v50, %v9986_v46  ;;  %v9987_v24 = vand.u32 4294901760, %v9448_v48 }
 0x43c   :  { %7996 = vmatprep.subr.bf16.mxu0 %v9117_v34  ;;  %v3709_v1 = vsub.f32 %v9584_v28, %v9966_v58  ;;  %v3716_v20 = vsub.f32 %v9589_v5, %v9964_v9  ;;  %v9991_v58 = vand.u32 4294901760, %v9143_v12  ;;  %v9994_v12 = vand.u32 4294901760, %v9168_v14 }
 0x43d   :  { %v9597_v0 = vpack.c.bf16 %v3703_v43, %v3696_v53  ;;  %v9614_v43 = vsub.f32 %v9448_v48, %v9987_v24  ;;  %v9965_v38 = vand.u32 4294901760, %v9608_v36  ;;  %v9998_v14 = vand.u32 4294901760, %v9199_v62 }
 0x43e   :  { %v3710_v53 = vand.u32 4294901760, %v3709_v1  ;;  %v3717_v29 = vand.u32 4294901760, %v3716_v20  ;;  %v9988_v1 = vand.u32 4294901760, %v9112_v6  ;;  %v9989_v20 = vand.u32 4294901760, %v9114_v30 }
 0x43f   :  { %7998 = vmatpush3.bf16.msra.mxu0 %v9117_v34  ;;  %v9969_v7 = vand.u32 4294901760, %v9614_v43  ;;  %v3723_v50 = vsub.f32 %v9608_v36, %v9965_v38  ;;  %v9990_v38 = vand.u32 4294901760, %v9141_v25  ;;  %v9644_v6 = vpack.c.bf16 %v9438_v16, %v9433_v51 }
 0x440   :  { %8000 = vmatprep.subr.bf16.mxu0 %v9129_v11  ;;  %v9619_v9 = vpack.c.bf16 %v3717_v29, %v3710_v53  ;;  %v8011_v46 = vpack.c.bf16 %v9989_v20, %v9988_v1  ;;  %v9649_v30 = vpack.c.bf16 %v9476_v61, %v9471_v54  ;;  %v9993_v25 = vand.u32 4294901760, %v9166_v10 }
 0x441   :  { %v3730_v48 = vsub.f32 %v9614_v43, %v9969_v7  ;;  %v3724_v24 = vand.u32 4294901760, %v3723_v50  ;;  %v8015_v40 = vpack.c.bf16 %v9991_v58, %v9990_v38  ;;  %v9992_v7 = vand.u32 4294901760, %v9146_v27 }
 0x442   :  { %v8019_v58 = vpack.c.bf16 %v9994_v12, %v9993_v25  ;;  %v9657_v27 = vpack.c.bf16 %v9497_v60, %v9492_v49  ;;  %v9995_v38 = vand.u32 4294901760, %v9170_v13  ;;  %v9997_v10 = vand.u32 4294901760, %v9197_v35 }
 0x443   :  { %8002 = vmatpush3.bf16.msra.mxu0 %v9129_v11  ;;  %v3731_v53 = vand.u32 4294901760, %v3730_v48  ;;  %v9665_v48 = vpack.c.bf16 %v9523_v32, %v9518_v44  ;;  %v9673_v1 = vpack.c.bf16 %v9548_v42, %v9542_v22  ;;  %v9999_v13 = vand.u32 4294901760, %v9218_v17 }
 0x444   :  { %8004 = vmatprep.subr.bf16.mxu0 %v9152_v33  ;;  %v10001_v35 = vand.u32 4294901760, %v9235_v26  ;;  %v10002_v62 = vand.u32 4294901760, %v9240_v56  ;;  %v10003_v17 = vand.u32 4294901760, %v9253_v57  ;;  %v9697_v12 = vpack.c.bf16 %v9614_v43, %v9608_v36  ;;  %v10007_v57 = vld [vmem:[#allocation9_spill] sm:$0xff] }
 0x445   :  { %v9634_v29 = vpack.c.bf16 %v3731_v53, %v3724_v24  ;;  %v9689_v53 = vpack.c.bf16 %v9589_v5, %v9584_v28 }
 0x446   :  { %v8035_v24 = vpack.c.bf16 %v10002_v62, %v10001_v35 }
 0x447   :  { %8006 = vmatpush3.bf16.msra.mxu0 %v9152_v33 }
 0x448   :  { %8008 = vmatprep.subr.bf16.mxu0 %v9180_v45 }
 0x44b   :  { %8010 = vmatpush3.bf16.msra.mxu0 %v9180_v45 }
 0x44c   :  { %8012 = vmatprep.subr.bf16.mxu0 %v8011_v46 }
 0x44e   :  { %7295 = vmatmul.mubr.f32.vlgmr.msra.gmra.mrb[24].mxu0 %v9992_v7  ;;  %v9996_v7 = vand.u32 4294901760, %v9172_v37  ;;  %v10000_v37 = vand.u32 4294901760, %v9221_v52  ;;  %v10004_v52 = vand.u32 4294901760, %v9258_v8  ;;  %v10008_v8 = vld [vmem:[#allocation10_spill] sm:$0xff] }
 0x44f   :  { %8014 = vmatpush3.bf16.msra.mxu0 %v8011_v46  ;;  %7329 = vmatprep.mubr.f32.mxu0 %v9030_v63  ;;  %v9681_v46 = vpack.c.bf16 %v9566_v31, %v9561_v55 }
 0x450   :  { %8016 = vmatprep.subr.bf16.mxu0 %v8015_v40  ;;  %v8023_v50 = vpack.c.bf16 %v9996_v7, %v9995_v38  ;;  %v8031_v20 = vpack.c.bf16 %v10000_v37, %v9999_v13  ;;  %v8039_v25 = vpack.c.bf16 %v10004_v52, %v10003_v17  ;;  %v10019_v38 = vand.u32 4294901760, %v9542_v22 }
 0x451   :  { %v10020_v7 = vand.u32 4294901760, %v9548_v42  ;;  %v10025_v22 = vand.u32 4294901760, %v9608_v36  ;;  %v10026_v42 = vand.u32 4294901760, %v9614_v43 }
 0x453   :  { %8018 = vmatpush3.bf16.msra.mxu0 %v8015_v40  ;;  %v8027_v40 = vpack.c.bf16 %v9998_v14, %v9997_v10  ;;  %v7847_v14 = vpack.c.bf16 %v10026_v42, %v10025_v22 }
 0x454   :  { %8020 = vmatprep.subr.bf16.mxu0 %v8019_v58 }
 0x457   :  { %8022 = vmatpush3.bf16.msra.mxu0 %v8019_v58 }
 0x458   :  { %8024 = vmatprep.subr.bf16.mxu0 %v8023_v50 }
 0x45b   :  { %8026 = vmatpush3.bf16.msra.mxu0 %v8023_v50  ;;  %v7835_v50 = vpack.c.bf16 %v10020_v7, %v10019_v38 }
 0x45c   :  { %8028 = vmatprep.subr.bf16.mxu0 %v8027_v40 }
 0x45f   :  { %8030 = vmatpush3.bf16.msra.mxu0 %v8027_v40 }
 0x460   :  { %8032 = vmatprep.subr.bf16.mxu0 %v8031_v20 }
 0x463   :  { %8034 = vmatpush3.bf16.msra.mxu0 %v8031_v20 }
 0x464   :  { %8036 = vmatprep.subr.bf16.mxu0 %v8035_v24 }
 0x467   :  { %8038 = vmatpush3.bf16.msra.mxu0 %v8035_v24 }
 0x468   :  { %8040 = vmatprep.subr.bf16.mxu0 %v8039_v25 }
 0x46b   :  { %8042 = vmatpush3.bf16.msra.mxu0 %v8039_v25 }
 0x46c   :  { %8044 = vmatprep.subr.bf16.mxu0 %v9054_v21 }
 0x46e   :  { %7330 = vmatmul.mubr.f32.vlgmr.msra.gmra.mrb[24].mxu0 %v9121_v18 }
 0x46f   :  { %8046 = vmatpush3.bf16.msra.mxu0 %v9054_v21  ;;  %7364 = vmatprep.mubr.f32.mxu0 %v9030_v63 }
 0x470   :  { %8048 = vmatprep.subr.bf16.mxu0 %v9067_v23 }
 0x473   :  { %8050 = vmatpush3.bf16.msra.mxu0 %v9067_v23 }
 0x474   :  { %8052 = vmatprep.subr.bf16.mxu0 %v9078_v59 }
 0x477   :  { %8054 = vmatpush3.bf16.msra.mxu0 %v9078_v59 }
 0x478   :  { %8056 = vmatprep.subr.bf16.mxu0 %v9088_v41 }
 0x47b   :  { %8058 = vmatpush3.bf16.msra.mxu0 %v9088_v41 }
 0x47c   :  { %8060 = vmatprep.subr.bf16.mxu0 %v9117_v34 }
 0x47f   :  { %8062 = vmatpush3.bf16.msra.mxu0 %v9117_v34 }
 0x480   :  { %8064 = vmatprep.subr.bf16.mxu0 %v9129_v11 }
 0x483   :  { %8066 = vmatpush3.bf16.msra.mxu0 %v9129_v11 }
 0x484   :  { %8068 = vmatprep.subr.bf16.mxu0 %v9152_v33 }
 0x487   :  { %8070 = vmatpush3.bf16.msra.mxu0 %v9152_v33 }
 0x488   :  { %8072 = vmatprep.subr.bf16.mxu0 %v9180_v45 }
 0x48b   :  { %8074 = vmatpush3.bf16.msra.mxu0 %v9180_v45 }
 0x48e   :  { %7365 = vmatmul.mubr.f32.vlgmr.msra.gmra.mrb[24].mxu0 %v9121_v18 }
 0x4a1   :  { %v6946_v63 = vpop.f32.mrb[22].mxu0 }
 0x4a2   :  { %v9718_v21 = vand.u32 4294901760, %v6946_v63  ;;  %v3469_v23 = vpop.f32.mrb[23].mxu0 }
 0x4a3   :  { %v9720_v59 = vand.u32 4294901760, %v3469_v23 }
 0x4a4   :  { %v9723_v41 = vsub.f32 %v6946_v63, %v9718_v21 }
 0x4a5   :  { %v3602_v34 = vsub.f32 %v3469_v23, %v9720_v59 }
 0x4a6   :  { %v3613_v11 = vand.u32 4294901760, %v9723_v41 }
 0x4a7   :  { %v3603_v33 = vand.u32 4294901760, %v3602_v34 }
 0x4a8   :  { %v3614_v45 = vsub.f32 %v9723_v41, %v3613_v11 }
 0x4a9   :  { %v3604_v26 = vsub.f32 %v3602_v34, %v3603_v33 }
 0x4aa   :  { %v3615_v56 = vand.u32 4294901760, %v3614_v45 }
 0x4ab   :  { %v3605_v18 = vand.u32 4294901760, %v3604_v26 }
 0x4ad   :  { %6979 = vmatprep.mubr.f32.mxu1 %v3605_v18 }
 0x4ae   :  { %6980 = vmatmul.mubr.f32.vlgmr.msra.gmra.mrb[24].mxu1 %v3615_v56  ;;  %v5447_v56 = vld [vmem:[%s9908_s8 + $0x8] sm:$0xff] }
 0x4af   :  { %7726 = vmatpush3.bf16.msra.mxu1 %v9484_v47  ;;  %7014 = vmatprep.mubr.f32.mxu1 %v9720_v59  ;;  %v10011_v47 = vand.u32 4294901760, %v9433_v51  ;;  %v10015_v51 = vand.u32 4294901760, %v9492_v49  ;;  %v10021_v49 = vand.u32 4294901760, %v9561_v55  ;;  %v4921_v55 = vld [vmem:[%s9900_s0] sm:$0xff] }
 0x4b0   :  { %7728 = vmatprep.subr.bf16.mxu1 %v9526_v3 }
 0x4b3   :  { %7730 = vmatpush3.bf16.msra.mxu1 %v9526_v3  ;;  %v10012_v3 = vand.u32 4294901760, %v9438_v16  ;;  %v10016_v16 = vand.u32 4294901760, %v9497_v60  ;;  %v10022_v60 = vand.u32 4294901760, %v9566_v31  ;;  %v4922_v31 = vld [vmem:[%s9900_s0 + $0x8] sm:$0xff] }
 0x4b4   :  { %7732 = vmatprep.subr.bf16.mxu1 %v9531_v39  ;;  %v4937_v40 = vsel %vm1642_vm2, %v4922_v31, 0  ;;  %v6025_v31 = vld [vmem:[%s9909_s9] ss:$0 sm:$0xff] }
 0x4b5   :  { %v7827_v58 = vpack.c.bf16 %v10016_v16, %v10015_v51  ;;  %v5016_v37 = vand.u32 4294901760, %v4937_v40 }
 0x4b7   :  { %7734 = vmatpush3.bf16.msra.mxu1 %v9531_v39  ;;  %v10005_v39 = vld [vmem:[#allocation7_spill] sm:$0xff]  ;;  %v5017_v62 = vsub.f32 %v4937_v40, %v5016_v37 }
 0x4b8   :  { %7736 = vmatprep.subr.bf16.mxu1 %v9553_v19 }
 0x4b9   :  { %v5018_v52 = vand.u32 4294901760, %v5017_v62 }
 0x4bb   :  { %7738 = vmatpush3.bf16.msra.mxu1 %v9553_v19  ;;  %v10010_v19 = vld [vmem:[#allocation12_spill] sm:$0xff] }
 0x4bc   :  { %7740 = vmatprep.subr.bf16.mxu1 %v9592_v15 }
 0x4bf   :  { %7742 = vmatpush3.bf16.msra.mxu1 %v9592_v15  ;;  %v7819_v15 = vpack.c.bf16 %v10012_v3, %v10011_v47 }
 0x4c0   :  { %7744 = vmatprep.subr.bf16.mxu1 %v9597_v0 }
 0x4c3   :  { %7746 = vmatpush3.bf16.msra.mxu1 %v9597_v0  ;;  %v10009_v0 = vld [vmem:[#allocation11_spill] sm:$0xff] }
 0x4c4   :  { %7748 = vmatprep.subr.bf16.mxu1 %v9619_v9 }
 0x4c7   :  { %7750 = vmatpush3.bf16.msra.mxu1 %v9619_v9  ;;  %v10006_v9 = vld [vmem:[#allocation8_spill] sm:$0xff] }
 0x4c8   :  { %7752 = vmatprep.subr.bf16.mxu1 %v9634_v29 }
 0x4cb   :  { %7754 = vmatpush3.bf16.msra.mxu1 %v9634_v29  ;;  %v10013_v29 = vand.u32 4294901760, %v9471_v54  ;;  %v10018_v54 = vand.u32 4294901760, %v9523_v32  ;;  %v10024_v32 = vand.u32 4294901760, %v9589_v5  ;;  %v4923_v5 = vld [vmem:[#allocation2] sm:$0xff] }
 0x4cc   :  { %7756 = vmatprep.subr.bf16.mxu1 %v9644_v6  ;;  %v4940_v36 = vand.u32 4294901760, %v4923_v5 }
 0x4ce   :  { %7015 = vmatmul.mubr.f32.vlgmr.msra.gmra.mrb[24].mxu1 %v9718_v21 }
 0x4cf   :  { %7758 = vmatpush3.bf16.msra.mxu1 %v9644_v6  ;;  %7049 = vmatprep.mubr.f32.mxu1 %v3602_v34  ;;  %v10014_v6 = vand.u32 4294901760, %v9476_v61 }
 0x4d0   :  { %7760 = vmatprep.subr.bf16.mxu1 %v9649_v30 }
 0x4d3   :  { %7762 = vmatpush3.bf16.msra.mxu1 %v9649_v30  ;;  %v7823_v30 = vpack.c.bf16 %v10014_v6, %v10013_v29 }
 0x4d4   :  { %7764 = vmatprep.subr.bf16.mxu1 %v9657_v27 }
 0x4d7   :  { %7766 = vmatpush3.bf16.msra.mxu1 %v9657_v27  ;;  %v10017_v27 = vand.u32 4294901760, %v9518_v44  ;;  %v10023_v44 = vand.u32 4294901760, %v9584_v28  ;;  %v4924_v28 = vld [vmem:[#allocation2 + $0x8] sm:$0xff] }
 0x4d8   :  { %7768 = vmatprep.subr.bf16.mxu1 %v9665_v48 }
 0x4d9   :  { %v7831_v61 = vpack.c.bf16 %v10018_v54, %v10017_v27  ;;  %v7843_v10 = vpack.c.bf16 %v10024_v32, %v10023_v44 }
 0x4db   :  { %7770 = vmatpush3.bf16.msra.mxu1 %v9665_v48  ;;  %v7839_v48 = vpack.c.bf16 %v10022_v60, %v10021_v49 }
 0x4dc   :  { %7772 = vmatprep.subr.bf16.mxu1 %v9673_v1 }
 0x4df   :  { %7774 = vmatpush3.bf16.msra.mxu1 %v9673_v1  ;;  %v5028_v1 = vsub.f32 %v4923_v5, %v4940_v36 }
 0x4e0   :  { %7776 = vmatprep.subr.bf16.mxu1 %v9681_v46 }
 0x4e3   :  { %7778 = vmatpush3.bf16.msra.mxu1 %v9681_v46  ;;  %v5029_v46 = vand.u32 4294901760, %v5028_v1 }
 0x4e4   :  { %7780 = vmatprep.subr.bf16.mxu1 %v9689_v53 }
 0x4e7   :  { %7782 = vmatpush3.bf16.msra.mxu1 %v9689_v53  ;;  %v5030_v53 = vsub.f32 %v5028_v1, %v5029_v46 }
 0x4e8   :  { %7784 = vmatprep.subr.bf16.mxu1 %v9697_v12 }
 0x4e9   :  { %v5031_v63 = vand.u32 4294901760, %v5030_v53 }
 0x4eb   :  { %7786 = vmatpush3.bf16.msra.mxu1 %v9697_v12 }
 0x4ec   :  { %7788 = vmatprep.subr.bf16.mxu1 %v9295_v4 }
 0x4ee   :  { %7050 = vmatmul.mubr.f32.vlgmr.msra.gmra.mrb[24].mxu1 %v9723_v41 }
 0x4ef   :  { %7790 = vmatpush3.bf16.msra.mxu1 %v9295_v4  ;;  %7084 = vmatprep.mubr.f32.mxu1 %v3603_v33 }
 0x4f0   :  { %7792 = vmatprep.subr.bf16.mxu1 %v9340_v2 }
 0x4f3   :  { %7794 = vmatpush3.bf16.msra.mxu1 %v9340_v2 }
 0x4f4   :  { %7796 = vmatprep.subr.bf16.mxu1 %v10005_v39 }
 0x4f7   :  { %7798 = vmatpush3.bf16.msra.mxu1 %v10005_v39 }
 0x4f8   :  { %7800 = vmatprep.subr.bf16.mxu1 %v10006_v9 }
 0x4fb   :  { %7802 = vmatpush3.bf16.msra.mxu1 %v10006_v9 }
 0x4fc   :  { %7804 = vmatprep.subr.bf16.mxu1 %v10007_v57 }
 0x4ff   :  { %7806 = vmatpush3.bf16.msra.mxu1 %v10007_v57 }
 0x500   :  { %7808 = vmatprep.subr.bf16.mxu1 %v10008_v8 }
 0x503   :  { %7810 = vmatpush3.bf16.msra.mxu1 %v10008_v8 }
 0x504   :  { %7812 = vmatprep.subr.bf16.mxu1 %v10009_v0 }
 0x507   :  { %7814 = vmatpush3.bf16.msra.mxu1 %v10009_v0 }
 0x508   :  { %7816 = vmatprep.subr.bf16.mxu1 %v10010_v19 }
 0x50b   :  { %7818 = vmatpush3.bf16.msra.mxu1 %v10010_v19 }
 0x50c   :  { %7820 = vmatprep.subr.bf16.mxu1 %v7819_v15 }
 0x50e   :  { %7085 = vmatmul.mubr.f32.vlgmr.msra.gmra.mrb[24].mxu1 %v3613_v11 }
 0x50f   :  { %7822 = vmatpush3.bf16.msra.mxu1 %v7819_v15  ;;  %7119 = vmatprep.mubr.f32.mxu1 %v9720_v59 }
 0x510   :  { %7824 = vmatprep.subr.bf16.mxu1 %v7823_v30 }
 0x513   :  { %7826 = vmatpush3.bf16.msra.mxu1 %v7823_v30 }
 0x514   :  { %7828 = vmatprep.subr.bf16.mxu1 %v7827_v58 }
 0x517   :  { %7830 = vmatpush3.bf16.msra.mxu1 %v7827_v58 }
 0x518   :  { %7832 = vmatprep.subr.bf16.mxu1 %v7831_v61 }
 0x51b   :  { %7834 = vmatpush3.bf16.msra.mxu1 %v7831_v61 }
 0x51c   :  { %7836 = vmatprep.subr.bf16.mxu1 %v7835_v50 }
 0x51f   :  { %7838 = vmatpush3.bf16.msra.mxu1 %v7835_v50 }
 0x520   :  { %7840 = vmatprep.subr.bf16.mxu1 %v7839_v48 }
 0x523   :  { %7842 = vmatpush3.bf16.msra.mxu1 %v7839_v48 }
 0x524   :  { %7844 = vmatprep.subr.bf16.mxu1 %v7843_v10 }
 0x527   :  { %7846 = vmatpush3.bf16.msra.mxu1 %v7843_v10 }
 0x528   :  { %7848 = vmatprep.subr.bf16.mxu1 %v7847_v14 }
 0x52b   :  { %7850 = vmatpush3.bf16.msra.mxu1 %v7847_v14 }
 0x52c   :  { %7852 = vmatprep.subr.bf16.mxu1 %v9295_v4 }
 0x52e   :  { %7120 = vmatmul.mubr.f32.vlgmr.msra.gmra.mrb[24].mxu1 %v9718_v21 }
 0x52f   :  { %7854 = vmatpush3.bf16.msra.mxu1 %v9295_v4  ;;  %7154 = vmatprep.mubr.f32.mxu1 %v9720_v59  ;;  %v4934_v4 = vsel %vm1642_vm2, %v4921_v55, 0  ;;  %v5019_v59 = vsub.f32 %v5017_v62, %v5018_v52 }
 0x530   :  { %7856 = vmatprep.subr.bf16.mxu1 %v9340_v2  ;;  %v5006_v43 = vand.u32 4294901760, %v4934_v4 }
 0x531   :  { %v5020_v11 = vand.u32 4294901760, %v5019_v59 }
 0x532   :  { %v5007_v20 = vsub.f32 %v4934_v4, %v5006_v43 }
 0x533   :  { %7858 = vmatpush3.bf16.msra.mxu1 %v9340_v2  ;;  %v4943_v2 = vand.u32 4294901760, %v4924_v28 }
 0x534   :  { %7860 = vmatprep.subr.bf16.mxu1 %v10005_v39  ;;  %v5008_v24 = vand.u32 4294901760, %v5007_v20 }
 0x535   :  { %v5035_v13 = vsub.f32 %v4924_v28, %v4943_v2  ;;  %v8075_v12 = vpack.c.bf16 %v4943_v2, %v4940_v36 }
 0x536   :  { %v5009_v25 = vsub.f32 %v5007_v20, %v5008_v24 }
 0x537   :  { %7862 = vmatpush3.bf16.msra.mxu1 %v10005_v39  ;;  %v5036_v35 = vand.u32 4294901760, %v5035_v13  ;;  %v8083_v33 = vpack.c.bf16 %v5035_v13, %v5028_v1 }
 0x538   :  { %7864 = vmatprep.subr.bf16.mxu1 %v10006_v9  ;;  %v5010_v41 = vand.u32 4294901760, %v5009_v25 }
 0x539   :  { %v5037_v17 = vsub.f32 %v5035_v13, %v5036_v35  ;;  %v8091_v18 = vpack.c.bf16 %v5036_v35, %v5029_v46  ;;  %v6026_v13 = vld [vmem:[%s9903_s3] ss:$0 sm:$0xff] }
 0x53b   :  { %7866 = vmatpush3.bf16.msra.mxu1 %v10006_v9  ;;  %v5038_v23 = vand.u32 4294901760, %v5037_v17  ;;  %v5461_v9 = vand.u32 4294901760, %v5447_v56 }
 0x53c   :  { %7868 = vmatprep.subr.bf16.mxu1 %v10007_v57 }
 0x53d   :  { %v8079_v34 = vpack.c.bf16 %v5038_v23, %v5031_v63  ;;  %v5555_v47 = vsub.f32 %v5447_v56, %v5461_v9 }
 0x53f   :  { %7870 = vmatpush3.bf16.msra.mxu1 %v10007_v57  ;;  %v5556_v6 = vand.u32 4294901760, %v5555_v47 }
 0x540   :  { %7872 = vmatprep.subr.bf16.mxu1 %v10008_v8 }
 0x541   :  { %v5557_v16 = vsub.f32 %v5555_v47, %v5556_v6 }
 0x543   :  { %7874 = vmatpush3.bf16.msra.mxu1 %v10008_v8  ;;  %v5448_v8 = vld [vmem:[%s9908_s8 + $0x10] sm:$0xff]  ;;  %v5558_v61 = vand.u32 4294901760, %v5557_v16 }
 0x544   :  { %7876 = vmatprep.subr.bf16.mxu1 %v10009_v0  ;;  %v5464_v3 = vand.u32 4294901760, %v5448_v8 }
 0x546   :  { %v5562_v58 = vsub.f32 %v5448_v8, %v5464_v3 }
 0x547   :  { %7878 = vmatpush3.bf16.msra.mxu1 %v10009_v0  ;;  %v5449_v0 = vld [vmem:[%s9908_s8 + $0x18] sm:$0xff] }
 0x548   :  { %7880 = vmatprep.subr.bf16.mxu1 %v10010_v19  ;;  %v5467_v15 = vand.u32 4294901760, %v5449_v0  ;;  %v5563_v38 = vand.u32 4294901760, %v5562_v58 }
 0x54a   :  { %v9858_v30 = vpack.c.bf16 %v5467_v15, %v5464_v3  ;;  %v5569_v27 = vsub.f32 %v5449_v0, %v5467_v15  ;;  %v5564_v49 = vsub.f32 %v5562_v58, %v5563_v38 }
 0x54b   :  { %7882 = vmatpush3.bf16.msra.mxu1 %v10010_v19 }
 0x54c   :  { %8076 = vmatprep.subr.bf16.mxu1 %v8075_v12  ;;  %v5570_v7 = vand.u32 4294901760, %v5569_v27  ;;  %v5565_v48 = vand.u32 4294901760, %v5564_v49  ;;  %v8119_v22 = vpack.c.bf16 %v5569_v27, %v5562_v58 }
 0x54e   :  { %7155 = vmatmul.mubr.f32.vlgmr.msra.gmra.mrb[24].mxu1 %v9718_v21  ;;  %v5446_v21 = vld [vmem:[%s9908_s8] sm:$0xff]  ;;  %v5571_v60 = vsub.f32 %v5569_v27, %v5570_v7  ;;  %v8135_v14 = vpack.c.bf16 %v5570_v7, %v5563_v38  ;;  %s8340_s8 = spop %8339 }
 0x54f   :  { %8078 = vmatpush3.bf16.msra.mxu1 %v8075_v12  ;;  %7371 = vmatprep.mubr.f32.mxu1 %v5010_v41  ;;  %v5458_v39 = vand.u32 4294901760, %v5446_v21  ;;  %v4204_v55 = vstv %s8340_s8 }
 0x550   :  { %8080 = vmatprep.subr.bf16.mxu1 %v8079_v34  ;;  %v5572_v44 = vand.u32 4294901760, %v5571_v60 }
 0x551   :  { %v9848_v57 = vpack.c.bf16 %v5461_v9, %v5458_v39  ;;  %v5548_v19 = vsub.f32 %v5446_v21, %v5458_v39  ;;  %v6027_v39 = vld [vmem:[%s9910_s10] ss:$0 sm:$0xff] }
 0x552   :  { %7372 = vmatmul.mubr.f32.vlgmr.msra.gmra.mrb[26].mxu1 %v5020_v11  ;;  %v8111_v32 = vpack.c.bf16 %v5572_v44, %v5565_v48 }
 0x553   :  { %8082 = vmatpush3.bf16.msra.mxu1 %v8079_v34  ;;  %7378 = vmatprep.mubr.f32.mxu1 %v5006_v43  ;;  %v5549_v29 = vand.u32 4294901760, %v5548_v19  ;;  %v8115_v10 = vpack.c.bf16 %v5555_v47, %v5548_v19 }
 0x554   :  { %8084 = vmatprep.subr.bf16.mxu1 %v8083_v33 }
 0x555   :  { %v5550_v51 = vsub.f32 %v5548_v19, %v5549_v29  ;;  %v8131_v42 = vpack.c.bf16 %v5556_v6, %v5549_v29 }
 0x557   :  { %v5551_v54 = vand.u32 4294901760, %v5550_v51 }
 0x559   :  { %v8107_v50 = vpack.c.bf16 %v5558_v61, %v5551_v54 }
 0x55a   :  { %7379 = vmatmul.mubr.f32.vlgmr.msra.gmra.mrb[26].mxu1 %v5016_v37 }
 0x55b   :  { %8086 = vmatpush3.bf16.msra.mxu1 %v8083_v33  ;;  %7385 = vmatprep.mubr.f32.mxu1 %v5007_v20 }
 0x55c   :  { %8088 = vmatprep.subr.bf16.mxu1 %v8075_v12 }
 0x561   :  { %v7366_v45 = vpop.f32.mrb[24].mxu0 }
 0x562   :  { %7386 = vmatmul.mubr.f32.vlgmr.msra.gmra.mrb[26].mxu1 %v5017_v62  ;;  %v4897_v26 = vpop.f32.mrb[25].mxu0 }
 0x563   :  { %8090 = vmatpush3.bf16.msra.mxu1 %v8075_v12  ;;  %7392 = vmatprep.mubr.f32.mxu1 %v5008_v24 }
 0x564   :  { %8092 = vmatprep.subr.bf16.mxu1 %v8091_v18 }
 0x56a   :  { %7393 = vmatmul.mubr.f32.vlgmr.msra.gmra.mrb[26].mxu1 %v5018_v52 }
 0x56b   :  { %8094 = vmatpush3.bf16.msra.mxu1 %v8091_v18  ;;  %7399 = vmatprep.mubr.f32.mxu1 %v5006_v43 }
 0x56c   :  { %8096 = vmatprep.subr.bf16.mxu1 %v8075_v12 }
 0x572   :  { %7400 = vmatmul.mubr.f32.vlgmr.msra.gmra.mrb[26].mxu1 %v5016_v37 }
 0x573   :  { %8098 = vmatpush3.bf16.msra.mxu1 %v8075_v12  ;;  %7406 = vmatprep.mubr.f32.mxu1 %v5006_v43 }
 0x574   :  { %8100 = vmatprep.subr.bf16.mxu1 %v9848_v57 }
 0x57a   :  { %7407 = vmatmul.mubr.f32.vlgmr.msra.gmra.mrb[26].mxu1 %v5016_v37 }
 0x57b   :  { %8102 = vmatpush3.bf16.msra.mxu1 %v9848_v57 }
 0x57c   :  { %8104 = vmatprep.subr.bf16.mxu1 %v9858_v30 }
 0x57f   :  { %8106 = vmatpush3.bf16.msra.mxu1 %v9858_v30 }
 0x580   :  { %8108 = vmatprep.subr.bf16.mxu1 %v8107_v50 }
 0x621   :  { %v7156_v5 = vpop.f32.mrb[24].mxu1 }
 0x622   :  { %v4206_v28 = vmul.f32 %v7156_v5, %v4204_v55  ;;  %v4194_v4 = vpop.f32.mrb[25].mxu1 }
 0x623   :  { %v4205_v36 = vmul.f32 %v4204_v55, %v4194_v4 }
 0x624   :  { %v4908_v2 = vadd.f32 %v7366_v45, %v4206_v28 }
 0x625   :  { %v4907_v43 = vadd.f32 %v4897_v26, %v4205_v36 }
 0x626   :  { %v4917_v40 = vadd.f32 %v6025_v31, %v4908_v2 }
 0x627   :  { %v4916_v1 = vadd.f32 %v6025_v31, %v4907_v43 }
 0x628   :  { %4919 = vst.msk [vmem:[#allocation3 + $0x8] sm:$0xff] %vm545_vm1, %v4917_v40 }
 0x629   :  { %4918 = vst.msk [vmem:[#allocation3] sm:$0xff] %vm545_vm1, %v4916_v1 }
 0x62f   :  { %v5445_v45 = vld [vmem:[#allocation3 + $0x8] sm:$0xff] }
 0x630   :  { %v5444_v21 = vld [vmem:[#allocation3] sm:$0xff] }
 0x64d   :  { %v7408_v37 = vpop.f32.mrb[26].mxu1 }
 0x64e   :  { %v8175_v20 = vadd.f32 %v7408_v37, %v6026_v13  ;;  %v5431_v46 = vpop.f32.mrb[27].mxu1 }
 0x64f   :  { %v8176_v35 = vadd.f32 %v6026_v13, %v5431_v46 }
 0x650   :  { %v5442_v62 = vmax.f32 %v8175_v20, 0.0 }
 0x651   :  { %v5441_v24 = vmax.f32 %v8176_v35, 0.0 }
 0x652   :  { %v5455_v53 = vsel %vm545_vm1, %v5442_v62, 0 }
 0x653   :  { %v5536_v17 = vand.u32 4294901760, %v5455_v53  ;;  %v5452_v52 = vsel %vm545_vm1, %v5441_v24, 0 }
 0x654   :  { %v5526_v25 = vand.u32 4294901760, %v5452_v52 }
 0x655   :  { %v5537_v12 = vsub.f32 %v5455_v53, %v5536_v17 }
 0x656   :  { %v5527_v63 = vsub.f32 %v5452_v52, %v5526_v25 }
 0x657   :  { %v5538_v23 = vand.u32 4294901760, %v5537_v12 }
 0x658   :  { %v5528_v59 = vand.u32 4294901760, %v5527_v63 }
 0x659   :  { %v5539_v41 = vsub.f32 %v5537_v12, %v5538_v23 }
 0x65a   :  { %v5529_v34 = vsub.f32 %v5527_v63, %v5528_v59 }
 0x65b   :  { %v5540_v33 = vand.u32 4294901760, %v5539_v41 }
 0x65c   :  { %v5530_v11 = vand.u32 4294901760, %v5529_v34 }
 0x65e   :  { %7417 = vmatprep.mubr.f32.mxu1 %v5530_v11 }
 0x65f   :  { %7418 = vmatmul.mubr.f32.vlgmr.msra.gmra.mrb[28].mxu1 %v5540_v33 }
 0x660   :  { %8110 = vmatpush3.bf16.msra.mxu1 %v8107_v50  ;;  %7428 = vmatprep.mubr.f32.mxu1 %v5526_v25 }
 0x661   :  { %8112 = vmatprep.subr.bf16.mxu1 %v8111_v32 }
 0x664   :  { %8114 = vmatpush3.bf16.msra.mxu1 %v8111_v32 }
 0x665   :  { %8116 = vmatprep.subr.bf16.mxu1 %v8115_v10 }
 0x667   :  { %7429 = vmatmul.mubr.f32.vlgmr.msra.gmra.mrb[28].mxu1 %v5536_v17 }
 0x668   :  { %8118 = vmatpush3.bf16.msra.mxu1 %v8115_v10  ;;  %7439 = vmatprep.mubr.f32.mxu1 %v5527_v63 }
 0x669   :  { %8120 = vmatprep.subr.bf16.mxu1 %v8119_v22 }
 0x66c   :  { %8122 = vmatpush3.bf16.msra.mxu1 %v8119_v22 }
 0x66d   :  { %8124 = vmatprep.subr.bf16.mxu1 %v9848_v57 }
 0x66f   :  { %7440 = vmatmul.mubr.f32.vlgmr.msra.gmra.mrb[28].mxu1 %v5537_v12 }
 0x670   :  { %8126 = vmatpush3.bf16.msra.mxu1 %v9848_v57  ;;  %7450 = vmatprep.mubr.f32.mxu1 %v5528_v59 }
 0x671   :  { %8128 = vmatprep.subr.bf16.mxu1 %v9858_v30 }
 0x674   :  { %8130 = vmatpush3.bf16.msra.mxu1 %v9858_v30 }
 0x675   :  { %8132 = vmatprep.subr.bf16.mxu1 %v8131_v42 }
 0x677   :  { %7451 = vmatmul.mubr.f32.vlgmr.msra.gmra.mrb[28].mxu1 %v5538_v23 }
 0x678   :  { %8134 = vmatpush3.bf16.msra.mxu1 %v8131_v42  ;;  %7461 = vmatprep.mubr.f32.mxu1 %v5526_v25 }
 0x679   :  { %8136 = vmatprep.subr.bf16.mxu1 %v8135_v14 }
 0x67c   :  { %8138 = vmatpush3.bf16.msra.mxu1 %v8135_v14 }
 0x67d   :  { %8140 = vmatprep.subr.bf16.mxu1 %v9848_v57 }
 0x67f   :  { %7462 = vmatmul.mubr.f32.vlgmr.msra.gmra.mrb[28].mxu1 %v5536_v17 }
 0x680   :  { %8142 = vmatpush3.bf16.msra.mxu1 %v9848_v57  ;;  %7472 = vmatprep.mubr.f32.mxu1 %v5526_v25  ;;  %v6028_v57 = vld [vmem:[%s9911_s11] ss:$0 sm:$0xff] }
 0x681   :  { %8144 = vmatprep.subr.bf16.mxu1 %v9858_v30 }
 0x684   :  { %8146 = vmatpush3.bf16.msra.mxu1 %v9858_v30 }
 0x687   :  { %7473 = vmatmul.mubr.f32.vlgmr.msra.gmra.mrb[28].mxu1 %v5536_v17 }
 0x75a   :  { %v7474_v26 = vpop.f32.mrb[28].mxu1 }
 0x75b   :  { %v5986_v18 = vadd.f32 %v7474_v26, %v5445_v45  ;;  %v5975_v56 = vpop.f32.mrb[29].mxu1 }
 0x75c   :  { %v5985_v9 = vadd.f32 %v5975_v56, %v5444_v21 }
 0x75d   :  { %v5988_v8 = vmax.f32 %v5986_v18, 0.0 }
 0x75e   :  { %v5987_v0 = vmax.f32 %v5985_v9, 0.0 }
 0x75f   :  { %v5997_v19 = vmul.f32 %v6027_v39, %v5988_v8 }
 0x760   :  { %v5996_v47 = vmul.f32 %v6027_v39, %v5987_v0 }
 0x761   :  { %v6006_v3 = vadd.f32 %v6028_v57, %v5997_v19 }
 0x762   :  { %v6005_v15 = vadd.f32 %v6028_v57, %v5996_v47 }
 0x763   :  { %6008 = vst.msk [vmem:[#allocation4 + $0x8] sm:$0xff] %vm545_vm1, %v6006_v3 }
 0x764   :  { %6007 = vst.msk [vmem:[#allocation4] sm:$0xff] %vm545_vm1, %v6005_v15 }
 0x765   :  { %8358 = shalt.err (!%p8355_p4)
}
 0x766   :  { %s8359_s2 = scalar_lea.hbm %s9912_s12, 256 }
 0x767   :  { %p8360_p5 = scmp.ne.s32.totalorder %s9912_s12, %s8359_s2  ;;  %p8363_p6 = scmp.lt.u32.totalorder %s8359_s2, %s9912_s12 }
 0x769   :  { %p8365_p7 = pnand %p8363_p6, %p8360_p5 }
 0x76b   :  { %8368 = shalt.err (!%p8365_p7)
}
 0x76c   :  { %s8373_s15 = smov 128   ;;  %s8374_s5 = smov 8  }
 0x76d   :  { %6020 = dma.vmem_to_hbm [thread:$0]  %s6015_s30, 256, %s9912_s12, [#allocation5], %s8373_s15, %s8373_s15, %s8374_s5  }
 0x76e   :  { %8369 = dma.done.wait [#allocation5], 256  }
 0x76f   :  { %8370 = vsyncadd [#allocation5], 4294967040 }
 0x770   :  { %6024 = vsyncpa [#allocation5], 1 }

</bundles_post_ra>
